<compile_context>
chip_gen: v7x
topology: tpu7x:2x2x1
jax: 0.10.0
libtpu: 0.0.40
codegen_flags: <defaults>
</compile_context>

<pallas_src>
import jax
import jax.numpy as jnp
import numpy as np
from jax.experimental import pallas as pl
from jax.experimental.pallas import tpu as pltpu

# --- small, module-consistent hyper-parameters ---
VOCAB = 50        # embedding rows
EMBED = 16        # embed_size
HID = 32          # hidden_size (enc_hid == dec_hid)
OUT = 40          # output_size
NLAYERS = 2       # n_layers of the GRU
BATCH = 2
SRC_LEN = 8
DECODE_STEPS = 4  # fused decode steps in the demo

PACK_W = 128      # lane-dense packed-parameter / slab width
OUT_PAD = PACK_W  # padded logits width (lane-dense store)
XW = EMBED + 2 * HID   # 80 = occupied lanes of the fused [embed | weighted] slab


def _build_layout():
  """Row offsets of every parameter block inside the packed [R_PAD, 128] buffer.

  Blocks whose rows must match the lane layout of the fused input slab
  (embed at lanes [0,E), weighted/enc at lanes [E, E+2H)) are 128 rows wide.
  Every block start is 8-aligned (sublane tile).
  """
  blocks = [
      ('attn_w_h', HID),        # attn_w[:H]                       [H, H]
      ('attn_w_e', PACK_W),     # attn_w[H:] placed at rows [E,E+2H)
      ('attn_b', 1),
      ('v_w', 1),
      ('w_ih0', PACK_W),        # GRU-0 input weights, rows 0:E+2H match slab lanes
      ('w_hh0', HID),
      ('b_ih0', 1), ('b_hh0', 1),
      ('w_ih1', HID), ('w_hh1', HID),
      ('b_ih1', 1), ('b_hh1', 1),
      ('fc_w_h', HID),          # fc_w[:H]  (multiplies the new top hidden)
      ('fc_w_ew', PACK_W),      # fc_w[H:]  rows 0:E+2H match slab lanes
      ('fc_b', 1),
  ]
  off, r = {}, 0
  for name, n in blocks:
    off[name] = r
    r += ((n + 7) // 8) * 8     # 8-align every block
  return off, r


OFF, R_PAD = _build_layout()


def decoder_kernel(emb_ref,       # VMEM [T, B, 128]  embeddings at lanes [0, E)
                   hid_ref,       # VMEM [L, B, H]    initial GRU state
                   enc_ref,       # VMEM [B, S, 128]  encoder outputs at lanes [E, E+2H)
                   maskb_ref,     # VMEM [B, S]       additive mask bias (0 / -1e10)
                   p_ref,         # VMEM [R_PAD, 128] packed parameters (one DMA)
                   out_ref,       # VMEM [T, B, 128]  lane-dense logits (OUT padded)
                   hid_out_ref):  # VMEM [L, B, H]    final GRU state
  f32 = jnp.float32
  H = HID

  def pv(name, nrows):
    r0 = OFF[name]
    return p_ref[r0:r0 + nrows, :]          # full 128-lane (unmasked) weight views

  # ---- loop-invariant loads ----
  enc = enc_ref[...]                        # [B, S, 128]
  B, S, _ = enc.shape

  attn_w_h = pv('attn_w_h', H)              # [H, 128]
  v_w = pv('v_w', 1)                        # [1, 128]
  w_ih0 = pv('w_ih0', PACK_W)               # [128, 128]  rows 0:E+2H real, rest 0
  w_hh0 = pv('w_hh0', H)
  b_ih0 = pv('b_ih0', 1)
  b_hh0 = pv('b_hh0', 1)
  w_ih1 = pv('w_ih1', H)
  w_hh1 = pv('w_hh1', H)
  b_ih1 = pv('b_ih1', 1)
  b_hh1 = pv('b_hh1', 1)
  fc_w_h = pv('fc_w_h', H)                  # [H, 128]
  fc_w_ew = pv('fc_w_ew', PACK_W)           # [128, 128]  rows 0:E+2H real, rest 0
  fc_b = pv('fc_b', 1)
  mask_bias = maskb_ref[...]                # [B, S]

  # ---- hoisted: encoder-side attention projection (invariant across decode steps) ----
  part_e = (jnp.dot(enc.reshape(B * S, PACK_W), pv('attn_w_e', PACK_W),
                    preferred_element_type=f32)
            + pv('attn_b', 1)).reshape(B, S, PACK_W)

  hid = hid_ref[...]                        # [L, B, H]
  T = out_ref.shape[0]

  def gru_cell(gi, gh, h):
    # PyTorch gate order (r, z, n); gi/gh are [B, 128] with gates at lanes 0:3H.
    r = jax.nn.sigmoid(gi[:, 0:H] + gh[:, 0:H])
    z = jax.nn.sigmoid(gi[:, H:2 * H] + gh[:, H:2 * H])
    n = jnp.tanh(gi[:, 2 * H:3 * H] + r * gh[:, 2 * H:3 * H])
    return (1.0 - z) * n + z * h

  def step(t, carry):
    h0, h1 = carry
    embed = emb_ref[t]                                              # [B, 128], lanes [0,E)

    # -- additive attention (encoder projection reused; only the h-side per step) --
    part_h = jnp.dot(h1, attn_w_h, preferred_element_type=f32)      # [B, 128]
    energy = jnp.tanh(part_e + part_h[:, None, :])                  # [B, S, 128]
    score = jnp.sum(energy * v_w, axis=2) + mask_bias               # [B, S]
    score = score - jnp.max(score, axis=1, keepdims=True)
    es = jnp.exp(score)
    probs = es / jnp.sum(es, axis=1, keepdims=True)                 # exact divide

    # context vector; lands at lanes [E, E+2H) because enc is pre-shifted there
    weighted = jnp.sum(probs[:, :, None] * enc, axis=1)             # [B, 128]

    # -- fused GRU-0 input slab: [embed | weighted] via one add (disjoint lanes) --
    x0 = embed + weighted                                           # [B, 128]

    gi0 = jnp.dot(x0, w_ih0, preferred_element_type=f32) + b_ih0    # one K=128 dot
    gh0 = jnp.dot(h0, w_hh0, preferred_element_type=f32) + b_hh0
    h0n = gru_cell(gi0, gh0, h0)

    gi1 = jnp.dot(h0n, w_ih1, preferred_element_type=f32) + b_ih1
    gh1 = jnp.dot(h1, w_hh1, preferred_element_type=f32) + b_hh1
    h1n = gru_cell(gi1, gh1, h1)

    # -- fc1(cat(out, embed, weighted)): reuse the x0 slab -> 2 dots instead of 3 --
    logits = (jnp.dot(h1n, fc_w_h, preferred_element_type=f32)
              + jnp.dot(x0, fc_w_ew, preferred_element_type=f32)
              + fc_b)                                               # [B, 128]
    out_ref[t] = logits
    return (h0n, h1n)

  h0f, h1f = jax.lax.fori_loop(0, T, step, (hid[0], hid[1]), unroll=True)
  hid_out_ref[0] = h0f
  hid_out_ref[1] = h1f


def pack_params(p):
  """Pack all parameters into one lane-dense, zero-filled [R_PAD, 128] f32 buffer."""
  E, H = EMBED, HID
  buf = jnp.zeros((R_PAD, PACK_W), jnp.float32)

  def put(b, name, arr, row_off=0):
    r0 = OFF[name] + row_off
    return b.at[r0:r0 + arr.shape[0], 0:arr.shape[1]].set(arr.astype(jnp.float32))

  buf = put(buf, 'attn_w_h', p['attn_w'][:H])
  buf = put(buf, 'attn_w_e', p['attn_w'][H:], row_off=E)   # enc features live at lanes [E, E+2H)
  buf = put(buf, 'attn_b', p['attn_b'])
  buf = put(buf, 'v_w', p['v_w'])
  buf = put(buf, 'w_ih0', p['w_ih0'])                      # rows 0:E+2H match slab lanes
  buf = put(buf, 'w_hh0', p['w_hh0'])
  buf = put(buf, 'b_ih0', p['b_ih0'])
  buf = put(buf, 'b_hh0', p['b_hh0'])
  buf = put(buf, 'w_ih1', p['w_ih1'])
  buf = put(buf, 'w_hh1', p['w_hh1'])
  buf = put(buf, 'b_ih1', p['b_ih1'])
  buf = put(buf, 'b_hh1', p['b_hh1'])
  buf = put(buf, 'fc_w_h', p['fc_w'][:H])
  buf = put(buf, 'fc_w_ew', p['fc_w'][H:])                 # rows 0:E+2H match slab lanes
  buf = put(buf, 'fc_b', p['fc_b'])
  return buf


def init_params(key):
  """Deterministic synthetic parameters (weights stored pre-transposed: x @ W)."""
  ks = jax.random.split(key, 14)

  def u(k, shape, scale=0.1):
    return jax.random.uniform(k, shape, jnp.float32, -1.0, 1.0) * scale

  p = {}
  p['emb'] = u(ks[0], (VOCAB, EMBED))
  p['attn_w'] = u(ks[1], (3 * HID, HID))            # Attention.attn (3H -> H)
  p['attn_b'] = u(ks[2], (1, HID))
  p['v_w'] = u(ks[3], (1, HID))                     # Attention.v (H -> 1, no bias)
  p['w_ih0'] = u(ks[4], (EMBED + 2 * HID, 3 * HID)) # GRU layer 0
  p['w_hh0'] = u(ks[5], (HID, 3 * HID))
  p['b_ih0'] = u(ks[6], (1, 3 * HID))
  p['b_hh0'] = u(ks[7], (1, 3 * HID))
  p['w_ih1'] = u(ks[8], (HID, 3 * HID))             # GRU layer 1
  p['w_hh1'] = u(ks[9], (HID, 3 * HID))
  p['b_ih1'] = u(ks[10], (1, 3 * HID))
  p['b_hh1'] = u(ks[11], (1, 3 * HID))
  p['fc_w'] = u(ks[12], (3 * HID + EMBED, OUT))     # fc1
  p['fc_b'] = u(ks[13], (1, OUT))
  return p


@jax.jit
def decoder_decode(ids_seq, hidden, encoder_outputs, mask, p):
  """T fused teacher-forced decode steps in ONE pallas_call (no per-step grid).

  ids_seq [T, B] int32; hidden [L, B, H]; encoder_outputs [S, B, 2H]; mask [B, S].
  Returns (logits [T, B, OUT], new_hidden [L, B, H]).
  """
  T, B = ids_seq.shape
  S = encoder_outputs.shape[0]

  # Pre-gather embeddings (dropout == identity in eval) and place at lanes [0, E).
  embed = p['emb'][ids_seq.astype(jnp.int32)].astype(jnp.float32)            # [T, B, E]
  embed_pad = jnp.zeros((T, B, PACK_W), jnp.float32).at[:, :, :EMBED].set(embed)

  # Encoder outputs -> [B, S, 128] with the 2H features at lanes [E, E+2H) so that
  # (embed_pad + weighted) IS the fused GRU-input slab with zero in-kernel staging.
  enc = jnp.transpose(encoder_outputs, (1, 0, 2)).astype(jnp.float32)        # [B, S, 2H]
  enc_pad = jnp.zeros((B, S, PACK_W), jnp.float32).at[:, :, EMBED:XW].set(enc)

  # Additive attention-mask bias, computed once in the wrapper.
  mask_bias = jnp.where(mask == 0, jnp.float32(-1e10), jnp.float32(0.0))     # [B, S]

  packed = pack_params(p)                                                    # one weight DMA

  vmem = pl.BlockSpec(memory_space=pltpu.MemorySpace.VMEM)
  logits_pad, hid_new = pl.pallas_call(
      decoder_kernel,
      out_shape=(jax.ShapeDtypeStruct((T, B, OUT_PAD), jnp.float32),
                 jax.ShapeDtypeStruct((NLAYERS, B, HID), jnp.float32)),
      in_specs=[vmem, vmem, vmem, vmem, vmem],
      out_specs=(vmem, vmem),
  )(embed_pad, hidden.astype(jnp.float32), enc_pad, mask_bias, packed)

  return logits_pad[:, :, :OUT], hid_new


def decoder_forward(ids, hidden, encoder_outputs, mask, p):
  """Single decoding step == PyTorch Decoder.forward(input, hidden, enc_out, mask)."""
  logits, hid_new = decoder_decode(ids.reshape(1, -1).astype(jnp.int32),
                                   hidden, encoder_outputs, mask, p)
  return logits[0], hid_new


def decoder_reference(ids, hidden, encoder_outputs, mask, p):
  """Pure-JAX reference mirroring the PyTorch forward semantics (single step)."""
  embed = p['emb'][ids]                                   # [B, E]
  h_top = hidden[-1]                                      # [B, H]
  enc = jnp.transpose(encoder_outputs, (1, 0, 2))         # [B, S, 2H]
  B, S, _ = enc.shape
  h_rep = jnp.broadcast_to(h_top[:, None, :], (B, S, HID))
  cat = jnp.concatenate([h_rep, enc], axis=2)
  energy = jnp.tanh(cat @ p['attn_w'] + p['attn_b'][0])
  score = jnp.sum(energy * p['v_w'][0], axis=2)
  score = jnp.where(mask == 0, -1e10, score)
  probs = jax.nn.softmax(score, axis=1)
  weighted = jnp.einsum('bs,bsh->bh', probs, enc)
  gru_in = jnp.concatenate([embed, weighted], axis=1)

  def gru_cell(x, h, w_ih, w_hh, b_ih, b_hh):
    gi = x @ w_ih + b_ih[0]
    gh = h @ w_hh + b_hh[0]
    r = jax.nn.sigmoid(gi[:, :HID] + gh[:, :HID])
    z = jax.nn.sigmoid(gi[:, HID:2 * HID] + gh[:, HID:2 * HID])
    n = jnp.tanh(gi[:, 2 * HID:] + r * gh[:, 2 * HID:])
    return (1.0 - z) * n + z * h

  h0 = gru_cell(gru_in, hidden[0], p['w_ih0'], p['w_hh0'], p['b_ih0'], p['b_hh0'])
  h1 = gru_cell(h0, hidden[1], p['w_ih1'], p['w_hh1'], p['b_ih1'], p['b_hh1'])
  fc_in = jnp.concatenate([h1, embed, weighted], axis=1)
  out = fc_in @ p['fc_w'] + p['fc_b'][0]
  return out, jnp.stack([h0, h1])


if __name__ == "__main__":
  key = jax.random.PRNGKey(0)
  kp, k1, k2, k3 = jax.random.split(key, 4)
  params = init_params(kp)

  ids_seq = jax.random.randint(k1, (DECODE_STEPS, BATCH), 0, VOCAB, dtype=jnp.int32)
  hidden = jax.random.normal(k2, (NLAYERS, BATCH, HID), jnp.float32)
  encoder_outputs = jax.random.normal(k3, (SRC_LEN, BATCH, 2 * HID), jnp.float32)
  mask = jnp.array([[1] * SRC_LEN,
                    [1] * (SRC_LEN - 3) + [0] * 3], dtype=jnp.int32)

  # --- fused multi-step decode (single pallas_call, in-kernel decode loop) ---
  out, hid_new = decoder_decode(ids_seq, hidden, encoder_outputs, mask, params)
  jax.block_until_ready((out, hid_new))

  # reference: loop the single-step module forward
  outs_ref = []
  h = hidden
  for t in range(DECODE_STEPS):
    o, h = decoder_reference(ids_seq[t], h, encoder_outputs, mask, params)
    outs_ref.append(o)
  out_ref = jnp.stack(outs_ref)

  np.testing.assert_allclose(np.asarray(out), np.asarray(out_ref), rtol=2e-3, atol=2e-3)
  np.testing.assert_allclose(np.asarray(hid_new), np.asarray(h), rtol=2e-3, atol=2e-3)

  # --- single-step API (exact PyTorch Decoder.forward signature semantics) ---
  out1, hid1 = decoder_forward(ids_seq[0], hidden, encoder_outputs, mask, params)
  jax.block_until_ready((out1, hid1))
  o_ref1, h_ref1 = decoder_reference(ids_seq[0], hidden, encoder_outputs, mask, params)
  np.testing.assert_allclose(np.asarray(out1), np.asarray(o_ref1), rtol=2e-3, atol=2e-3)
  np.testing.assert_allclose(np.asarray(hid1), np.asarray(h_ref1), rtol=2e-3, atol=2e-3)

  print("KERNEL_OK")
</pallas_src>

<mosaic_0001>
module attributes {stable_mosaic.version = 11 : i64} {
  func.func @decoder_kernel(%arg0: memref<4x2x128xf32, #tpu.memory_space<vmem>>, %arg1: memref<2x2x32xf32, #tpu.memory_space<vmem>>, %arg2: memref<2x8x128xf32, #tpu.memory_space<vmem>>, %arg3: memref<2x8xf32, #tpu.memory_space<vmem>>, %arg4: memref<600x128xf32, #tpu.memory_space<vmem>>, %arg5: memref<4x2x128xf32, #tpu.memory_space<vmem>>, %arg6: memref<2x2x32xf32, #tpu.memory_space<vmem>>) attributes {dimension_semantics = [], scalar_prefetch = 0 : i64, scratch_operands = 0 : i64, tpu.core_type = #tpu.core_type<tc>} {
    %c0 = arith.constant 0 : index
    %c0_0 = arith.constant 0 : index
    %c0_1 = arith.constant 0 : index
    %0 = vector.load %arg2[%c0, %c0_0, %c0_1] : memref<2x8x128xf32, #tpu.memory_space<vmem>>, vector<2x8x128xf32>
    %c0_2 = arith.constant 0 : index
    %c0_3 = arith.constant 0 : index
    %1 = vector.load %arg4[%c0_2, %c0_3] : memref<600x128xf32, #tpu.memory_space<vmem>>, vector<32x128xf32>
    %c168 = arith.constant 168 : index
    %c0_4 = arith.constant 0 : index
    %2 = vector.load %arg4[%c168, %c0_4] : memref<600x128xf32, #tpu.memory_space<vmem>>, vector<1x128xf32>
    %c176 = arith.constant 176 : index
    %c0_5 = arith.constant 0 : index
    %3 = vector.load %arg4[%c176, %c0_5] : memref<600x128xf32, #tpu.memory_space<vmem>>, vector<128x128xf32>
    %c304 = arith.constant 304 : index
    %c0_6 = arith.constant 0 : index
    %4 = vector.load %arg4[%c304, %c0_6] : memref<600x128xf32, #tpu.memory_space<vmem>>, vector<32x128xf32>
    %c336 = arith.constant 336 : index
    %c0_7 = arith.constant 0 : index
    %5 = vector.load %arg4[%c336, %c0_7] : memref<600x128xf32, #tpu.memory_space<vmem>>, vector<1x128xf32>
    %c344 = arith.constant 344 : index
    %c0_8 = arith.constant 0 : index
    %6 = vector.load %arg4[%c344, %c0_8] : memref<600x128xf32, #tpu.memory_space<vmem>>, vector<1x128xf32>
    %c352 = arith.constant 352 : index
    %c0_9 = arith.constant 0 : index
    %7 = vector.load %arg4[%c352, %c0_9] : memref<600x128xf32, #tpu.memory_space<vmem>>, vector<32x128xf32>
    %c384 = arith.constant 384 : index
    %c0_10 = arith.constant 0 : index
    %8 = vector.load %arg4[%c384, %c0_10] : memref<600x128xf32, #tpu.memory_space<vmem>>, vector<32x128xf32>
    %c416 = arith.constant 416 : index
    %c0_11 = arith.constant 0 : index
    %9 = vector.load %arg4[%c416, %c0_11] : memref<600x128xf32, #tpu.memory_space<vmem>>, vector<1x128xf32>
    %c424 = arith.constant 424 : index
    %c0_12 = arith.constant 0 : index
    %10 = vector.load %arg4[%c424, %c0_12] : memref<600x128xf32, #tpu.memory_space<vmem>>, vector<1x128xf32>
    %c432 = arith.constant 432 : index
    %c0_13 = arith.constant 0 : index
    %11 = vector.load %arg4[%c432, %c0_13] : memref<600x128xf32, #tpu.memory_space<vmem>>, vector<32x128xf32>
    %c464 = arith.constant 464 : index
    %c0_14 = arith.constant 0 : index
    %12 = vector.load %arg4[%c464, %c0_14] : memref<600x128xf32, #tpu.memory_space<vmem>>, vector<128x128xf32>
    %c592 = arith.constant 592 : index
    %c0_15 = arith.constant 0 : index
    %13 = vector.load %arg4[%c592, %c0_15] : memref<600x128xf32, #tpu.memory_space<vmem>>, vector<1x128xf32>
    %c0_16 = arith.constant 0 : index
    %c0_17 = arith.constant 0 : index
    %14 = vector.load %arg3[%c0_16, %c0_17] : memref<2x8xf32, #tpu.memory_space<vmem>>, vector<2x8xf32>
    %15 = vector.shape_cast %0 : vector<2x8x128xf32> to vector<16x128xf32>
    %c32 = arith.constant 32 : index
    %c0_18 = arith.constant 0 : index
    %16 = vector.load %arg4[%c32, %c0_18] : memref<600x128xf32, #tpu.memory_space<vmem>>, vector<128x128xf32>
    %cst = arith.constant dense<0.000000e+00> : vector<16x128xf32>
    %17 = tpu.matmul %15, %16, %cst {dimension_numbers = #tpu.dot_dimension_numbers<[1], [0], [0], [1], [0, 0, 1, 1], [], []>} : vector<16x128xf32>, vector<128x128xf32>, vector<16x128xf32> -> vector<16x128xf32>
    %c160 = arith.constant 160 : index
    %c0_19 = arith.constant 0 : index
    %18 = vector.load %arg4[%c160, %c0_19] : memref<600x128xf32, #tpu.memory_space<vmem>>, vector<1x128xf32>
    %19 = vector.broadcast %18 : vector<1x128xf32> to vector<16x128xf32>
    %20 = arith.addf %17, %19 : vector<16x128xf32>
    %21 = vector.shape_cast %20 : vector<16x128xf32> to vector<2x8x128xf32>
    %c0_20 = arith.constant 0 : index
    %c0_21 = arith.constant 0 : index
    %c0_22 = arith.constant 0 : index
    %22 = vector.load %arg1[%c0_20, %c0_21, %c0_22] : memref<2x2x32xf32, #tpu.memory_space<vmem>>, vector<2x2x32xf32>
    %23 = vector.extract_strided_slice %22 {offsets = [0, 0, 0], sizes = [1, 2, 32], strides = [1, 1, 1]} : vector<2x2x32xf32> to vector<1x2x32xf32>
    %24 = vector.shape_cast %23 : vector<1x2x32xf32> to vector<2x32xf32>
    %25 = vector.extract_strided_slice %22 {offsets = [1, 0, 0], sizes = [1, 2, 32], strides = [1, 1, 1]} : vector<2x2x32xf32> to vector<1x2x32xf32>
    %26 = vector.shape_cast %25 : vector<1x2x32xf32> to vector<2x32xf32>
    %c0_i32 = arith.constant 0 : i32
    %27 = arith.index_cast %c0_i32 : i32 to index
    %c0_23 = arith.constant 0 : index
    %c0_24 = arith.constant 0 : index
    %28 = vector.load %arg0[%27, %c0_23, %c0_24] : memref<4x2x128xf32, #tpu.memory_space<vmem>>, vector<1x2x128xf32>
    %29 = vector.shape_cast %28 : vector<1x2x128xf32> to vector<2x128xf32>
    %cst_25 = arith.constant dense<0.000000e+00> : vector<2x128xf32>
    %30 = tpu.matmul %26, %1, %cst_25 {dimension_numbers = #tpu.dot_dimension_numbers<[1], [0], [0], [1], [0, 0, 1, 1], [], []>} : vector<2x32xf32>, vector<32x128xf32>, vector<2x128xf32> -> vector<2x128xf32>
    %31 = vector.shape_cast %30 : vector<2x128xf32> to vector<2x1x128xf32>
    %32 = vector.broadcast %31 : vector<2x1x128xf32> to vector<2x8x128xf32>
    %33 = arith.addf %21, %32 : vector<2x8x128xf32>
    %34 = math.tanh %33 : vector<2x8x128xf32>
    %35 = vector.shape_cast %2 : vector<1x128xf32> to vector<1x1x128xf32>
    %36 = vector.broadcast %35 : vector<1x1x128xf32> to vector<2x8x128xf32>
    %37 = arith.mulf %34, %36 : vector<2x8x128xf32>
    %cst_26 = arith.constant dense<0.000000e+00> : vector<2x8xf32>
    %38 = vector.multi_reduction <add>, %37, %cst_26 [2] : vector<2x8x128xf32> to vector<2x8xf32>
    %39 = arith.addf %38, %14 : vector<2x8xf32>
    %cst_27 = arith.constant dense<0xFF800000> : vector<2xf32>
    %40 = vector.multi_reduction <maximumf>, %39, %cst_27 [1] : vector<2x8xf32> to vector<2xf32>
    %41 = vector.shape_cast %40 : vector<2xf32> to vector<2x1xf32>
    %42 = vector.broadcast %41 : vector<2x1xf32> to vector<2x8xf32>
    %43 = arith.subf %39, %42 : vector<2x8xf32>
    %44 = math.exp %43 : vector<2x8xf32>
    %cst_28 = arith.constant dense<0.000000e+00> : vector<2xf32>
    %45 = vector.multi_reduction <add>, %44, %cst_28 [1] : vector<2x8xf32> to vector<2xf32>
    %46 = vector.shape_cast %45 : vector<2xf32> to vector<2x1xf32>
    %47 = vector.broadcast %46 : vector<2x1xf32> to vector<2x8xf32>
    %48 = arith.divf %44, %47 : vector<2x8xf32>
    %49 = vector.shape_cast %48 : vector<2x8xf32> to vector<2x8x1xf32>
    %50 = vector.broadcast %49 : vector<2x8x1xf32> to vector<2x8x128xf32>
    %51 = arith.mulf %50, %0 : vector<2x8x128xf32>
    %cst_29 = arith.constant dense<0.000000e+00> : vector<2x128xf32>
    %52 = vector.multi_reduction <add>, %51, %cst_29 [1] : vector<2x8x128xf32> to vector<2x128xf32>
    %53 = arith.addf %29, %52 : vector<2x128xf32>
    %cst_30 = arith.constant dense<0.000000e+00> : vector<2x128xf32>
    %54 = tpu.matmul %53, %3, %cst_30 {dimension_numbers = #tpu.dot_dimension_numbers<[1], [0], [0], [1], [0, 0, 1, 1], [], []>} : vector<2x128xf32>, vector<128x128xf32>, vector<2x128xf32> -> vector<2x128xf32>
    %55 = vector.broadcast %5 : vector<1x128xf32> to vector<2x128xf32>
    %56 = arith.addf %54, %55 : vector<2x128xf32>
    %cst_31 = arith.constant dense<0.000000e+00> : vector<2x128xf32>
    %57 = tpu.matmul %24, %4, %cst_31 {dimension_numbers = #tpu.dot_dimension_numbers<[1], [0], [0], [1], [0, 0, 1, 1], [], []>} : vector<2x32xf32>, vector<32x128xf32>, vector<2x128xf32> -> vector<2x128xf32>
    %58 = vector.broadcast %6 : vector<1x128xf32> to vector<2x128xf32>
    %59 = arith.addf %57, %58 : vector<2x128xf32>
    %60 = vector.extract_strided_slice %56 {offsets = [0, 0], sizes = [2, 32], strides = [1, 1]} : vector<2x128xf32> to vector<2x32xf32>
    %61 = vector.extract_strided_slice %59 {offsets = [0, 0], sizes = [2, 32], strides = [1, 1]} : vector<2x128xf32> to vector<2x32xf32>
    %62 = arith.addf %60, %61 : vector<2x32xf32>
    %63 = arith.negf %62 : vector<2x32xf32>
    %64 = math.exp %63 : vector<2x32xf32>
    %cst_32 = arith.constant 1.000000e+00 : f32
    %65 = vector.broadcast %cst_32 : f32 to vector<2x32xf32>
    %66 = arith.addf %65, %64 : vector<2x32xf32>
    %67 = arith.divf %65, %66 : vector<2x32xf32>
    %68 = vector.extract_strided_slice %56 {offsets = [0, 32], sizes = [2, 32], strides = [1, 1]} : vector<2x128xf32> to vector<2x32xf32>
    %69 = vector.extract_strided_slice %59 {offsets = [0, 32], sizes = [2, 32], strides = [1, 1]} : vector<2x128xf32> to vector<2x32xf32>
    %70 = arith.addf %68, %69 : vector<2x32xf32>
    %71 = arith.negf %70 : vector<2x32xf32>
    %72 = math.exp %71 : vector<2x32xf32>
    %cst_33 = arith.constant 1.000000e+00 : f32
    %73 = vector.broadcast %cst_33 : f32 to vector<2x32xf32>
    %74 = arith.addf %73, %72 : vector<2x32xf32>
    %75 = arith.divf %73, %74 : vector<2x32xf32>
    %76 = vector.extract_strided_slice %56 {offsets = [0, 64], sizes = [2, 32], strides = [1, 1]} : vector<2x128xf32> to vector<2x32xf32>
    %77 = vector.extract_strided_slice %59 {offsets = [0, 64], sizes = [2, 32], strides = [1, 1]} : vector<2x128xf32> to vector<2x32xf32>
    %78 = arith.mulf %67, %77 : vector<2x32xf32>
    %79 = arith.addf %76, %78 : vector<2x32xf32>
    %80 = math.tanh %79 : vector<2x32xf32>
    %cst_34 = arith.constant 1.000000e+00 : f32
    %81 = vector.broadcast %cst_34 : f32 to vector<2x32xf32>
    %82 = arith.subf %81, %75 : vector<2x32xf32>
    %83 = arith.mulf %82, %80 : vector<2x32xf32>
    %84 = arith.mulf %75, %24 : vector<2x32xf32>
    %85 = arith.addf %83, %84 : vector<2x32xf32>
    %cst_35 = arith.constant dense<0.000000e+00> : vector<2x128xf32>
    %86 = tpu.matmul %85, %7, %cst_35 {dimension_numbers = #tpu.dot_dimension_numbers<[1], [0], [0], [1], [0, 0, 1, 1], [], []>} : vector<2x32xf32>, vector<32x128xf32>, vector<2x128xf32> -> vector<2x128xf32>
    %87 = vector.broadcast %9 : vector<1x128xf32> to vector<2x128xf32>
    %88 = arith.addf %86, %87 : vector<2x128xf32>
    %cst_36 = arith.constant dense<0.000000e+00> : vector<2x128xf32>
    %89 = tpu.matmul %26, %8, %cst_36 {dimension_numbers = #tpu.dot_dimension_numbers<[1], [0], [0], [1], [0, 0, 1, 1], [], []>} : vector<2x32xf32>, vector<32x128xf32>, vector<2x128xf32> -> vector<2x128xf32>
    %90 = vector.broadcast %10 : vector<1x128xf32> to vector<2x128xf32>
    %91 = arith.addf %89, %90 : vector<2x128xf32>
    %92 = vector.extract_strided_slice %88 {offsets = [0, 0], sizes = [2, 32], strides = [1, 1]} : vector<2x128xf32> to vector<2x32xf32>
    %93 = vector.extract_strided_slice %91 {offsets = [0, 0], sizes = [2, 32], strides = [1, 1]} : vector<2x128xf32> to vector<2x32xf32>
    %94 = arith.addf %92, %93 : vector<2x32xf32>
    %95 = arith.negf %94 : vector<2x32xf32>
    %96 = math.exp %95 : vector<2x32xf32>
    %cst_37 = arith.constant 1.000000e+00 : f32
    %97 = vector.broadcast %cst_37 : f32 to vector<2x32xf32>
    %98 = arith.addf %97, %96 : vector<2x32xf32>
    %99 = arith.divf %97, %98 : vector<2x32xf32>
    %100 = vector.extract_strided_slice %88 {offsets = [0, 32], sizes = [2, 32], strides = [1, 1]} : vector<2x128xf32> to vector<2x32xf32>
    %101 = vector.extract_strided_slice %91 {offsets = [0, 32], sizes = [2, 32], strides = [1, 1]} : vector<2x128xf32> to vector<2x32xf32>
    %102 = arith.addf %100, %101 : vector<2x32xf32>
    %103 = arith.negf %102 : vector<2x32xf32>
    %104 = math.exp %103 : vector<2x32xf32>
    %cst_38 = arith.constant 1.000000e+00 : f32
    %105 = vector.broadcast %cst_38 : f32 to vector<2x32xf32>
    %106 = arith.addf %105, %104 : vector<2x32xf32>
    %107 = arith.divf %105, %106 : vector<2x32xf32>
    %108 = vector.extract_strided_slice %88 {offsets = [0, 64], sizes = [2, 32], strides = [1, 1]} : vector<2x128xf32> to vector<2x32xf32>
    %109 = vector.extract_strided_slice %91 {offsets = [0, 64], sizes = [2, 32], strides = [1, 1]} : vector<2x128xf32> to vector<2x32xf32>
    %110 = arith.mulf %99, %109 : vector<2x32xf32>
    %111 = arith.addf %108, %110 : vector<2x32xf32>
    %112 = math.tanh %111 : vector<2x32xf32>
    %cst_39 = arith.constant 1.000000e+00 : f32
    %113 = vector.broadcast %cst_39 : f32 to vector<2x32xf32>
    %114 = arith.subf %113, %107 : vector<2x32xf32>
    %115 = arith.mulf %114, %112 : vector<2x32xf32>
    %116 = arith.mulf %107, %26 : vector<2x32xf32>
    %117 = arith.addf %115, %116 : vector<2x32xf32>
    %cst_40 = arith.constant dense<0.000000e+00> : vector<2x128xf32>
    %118 = tpu.matmul %117, %11, %cst_40 {dimension_numbers = #tpu.dot_dimension_numbers<[1], [0], [0], [1], [0, 0, 1, 1], [], []>} : vector<2x32xf32>, vector<32x128xf32>, vector<2x128xf32> -> vector<2x128xf32>
    %cst_41 = arith.constant dense<0.000000e+00> : vector<2x128xf32>
    %119 = tpu.matmul %53, %12, %cst_41 {dimension_numbers = #tpu.dot_dimension_numbers<[1], [0], [0], [1], [0, 0, 1, 1], [], []>} : vector<2x128xf32>, vector<128x128xf32>, vector<2x128xf32> -> vector<2x128xf32>
    %120 = arith.addf %118, %119 : vector<2x128xf32>
    %121 = vector.broadcast %13 : vector<1x128xf32> to vector<2x128xf32>
    %122 = arith.addf %120, %121 : vector<2x128xf32>
    %123 = arith.index_cast %c0_i32 : i32 to index
    %c0_42 = arith.constant 0 : index
    %c0_43 = arith.constant 0 : index
    %124 = vector.load %arg5[%123, %c0_42, %c0_43] : memref<4x2x128xf32, #tpu.memory_space<vmem>>, vector<1x2x128xf32>
    %125 = vector.shape_cast %124 : vector<1x2x128xf32> to vector<2x128xf32>
    %126 = vector.shape_cast %122 : vector<2x128xf32> to vector<1x2x128xf32>
    tpu.vector_store %arg5[%123, %c0_42, %c0_43], %126 {strides = array<i32>} : memref<4x2x128xf32, #tpu.memory_space<vmem>>, vector<1x2x128xf32>,
    %c1_i32 = arith.constant 1 : i32
    %127 = arith.index_cast %c1_i32 : i32 to index
    %c0_44 = arith.constant 0 : index
    %c0_45 = arith.constant 0 : index
    %128 = vector.load %arg0[%127, %c0_44, %c0_45] : memref<4x2x128xf32, #tpu.memory_space<vmem>>, vector<1x2x128xf32>
    %129 = vector.shape_cast %128 : vector<1x2x128xf32> to vector<2x128xf32>
    %cst_46 = arith.constant dense<0.000000e+00> : vector<2x128xf32>
    %130 = tpu.matmul %117, %1, %cst_46 {dimension_numbers = #tpu.dot_dimension_numbers<[1], [0], [0], [1], [0, 0, 1, 1], [], []>} : vector<2x32xf32>, vector<32x128xf32>, vector<2x128xf32> -> vector<2x128xf32>
    %131 = vector.shape_cast %130 : vector<2x128xf32> to vector<2x1x128xf32>
    %132 = vector.broadcast %131 : vector<2x1x128xf32> to vector<2x8x128xf32>
    %133 = arith.addf %21, %132 : vector<2x8x128xf32>
    %134 = math.tanh %133 : vector<2x8x128xf32>
    %135 = vector.shape_cast %2 : vector<1x128xf32> to vector<1x1x128xf32>
    %136 = vector.broadcast %135 : vector<1x1x128xf32> to vector<2x8x128xf32>
    %137 = arith.mulf %134, %136 : vector<2x8x128xf32>
    %cst_47 = arith.constant dense<0.000000e+00> : vector<2x8xf32>
    %138 = vector.multi_reduction <add>, %137, %cst_47 [2] : vector<2x8x128xf32> to vector<2x8xf32>
    %139 = arith.addf %138, %14 : vector<2x8xf32>
    %cst_48 = arith.constant dense<0xFF800000> : vector<2xf32>
    %140 = vector.multi_reduction <maximumf>, %139, %cst_48 [1] : vector<2x8xf32> to vector<2xf32>
    %141 = vector.shape_cast %140 : vector<2xf32> to vector<2x1xf32>
    %142 = vector.broadcast %141 : vector<2x1xf32> to vector<2x8xf32>
    %143 = arith.subf %139, %142 : vector<2x8xf32>
    %144 = math.exp %143 : vector<2x8xf32>
    %cst_49 = arith.constant dense<0.000000e+00> : vector<2xf32>
    %145 = vector.multi_reduction <add>, %144, %cst_49 [1] : vector<2x8xf32> to vector<2xf32>
    %146 = vector.shape_cast %145 : vector<2xf32> to vector<2x1xf32>
    %147 = vector.broadcast %146 : vector<2x1xf32> to vector<2x8xf32>
    %148 = arith.divf %144, %147 : vector<2x8xf32>
    %149 = vector.shape_cast %148 : vector<2x8xf32> to vector<2x8x1xf32>
    %150 = vector.broadcast %149 : vector<2x8x1xf32> to vector<2x8x128xf32>
    %151 = arith.mulf %150, %0 : vector<2x8x128xf32>
    %cst_50 = arith.constant dense<0.000000e+00> : vector<2x128xf32>
    %152 = vector.multi_reduction <add>, %151, %cst_50 [1] : vector<2x8x128xf32> to vector<2x128xf32>
    %153 = arith.addf %129, %152 : vector<2x128xf32>
    %cst_51 = arith.constant dense<0.000000e+00> : vector<2x128xf32>
    %154 = tpu.matmul %153, %3, %cst_51 {dimension_numbers = #tpu.dot_dimension_numbers<[1], [0], [0], [1], [0, 0, 1, 1], [], []>} : vector<2x128xf32>, vector<128x128xf32>, vector<2x128xf32> -> vector<2x128xf32>
    %155 = vector.broadcast %5 : vector<1x128xf32> to vector<2x128xf32>
    %156 = arith.addf %154, %155 : vector<2x128xf32>
    %cst_52 = arith.constant dense<0.000000e+00> : vector<2x128xf32>
    %157 = tpu.matmul %85, %4, %cst_52 {dimension_numbers = #tpu.dot_dimension_numbers<[1], [0], [0], [1], [0, 0, 1, 1], [], []>} : vector<2x32xf32>, vector<32x128xf32>, vector<2x128xf32> -> vector<2x128xf32>
    %158 = vector.broadcast %6 : vector<1x128xf32> to vector<2x128xf32>
    %159 = arith.addf %157, %158 : vector<2x128xf32>
    %160 = vector.extract_strided_slice %156 {offsets = [0, 0], sizes = [2, 32], strides = [1, 1]} : vector<2x128xf32> to vector<2x32xf32>
    %161 = vector.extract_strided_slice %159 {offsets = [0, 0], sizes = [2, 32], strides = [1, 1]} : vector<2x128xf32> to vector<2x32xf32>
    %162 = arith.addf %160, %161 : vector<2x32xf32>
    %163 = arith.negf %162 : vector<2x32xf32>
    %164 = math.exp %163 : vector<2x32xf32>
    %cst_53 = arith.constant 1.000000e+00 : f32
    %165 = vector.broadcast %cst_53 : f32 to vector<2x32xf32>
    %166 = arith.addf %165, %164 : vector<2x32xf32>
    %167 = arith.divf %165, %166 : vector<2x32xf32>
    %168 = vector.extract_strided_slice %156 {offsets = [0, 32], sizes = [2, 32], strides = [1, 1]} : vector<2x128xf32> to vector<2x32xf32>
    %169 = vector.extract_strided_slice %159 {offsets = [0, 32], sizes = [2, 32], strides = [1, 1]} : vector<2x128xf32> to vector<2x32xf32>
    %170 = arith.addf %168, %169 : vector<2x32xf32>
    %171 = arith.negf %170 : vector<2x32xf32>
    %172 = math.exp %171 : vector<2x32xf32>
    %cst_54 = arith.constant 1.000000e+00 : f32
    %173 = vector.broadcast %cst_54 : f32 to vector<2x32xf32>
    %174 = arith.addf %173, %172 : vector<2x32xf32>
    %175 = arith.divf %173, %174 : vector<2x32xf32>
    %176 = vector.extract_strided_slice %156 {offsets = [0, 64], sizes = [2, 32], strides = [1, 1]} : vector<2x128xf32> to vector<2x32xf32>
    %177 = vector.extract_strided_slice %159 {offsets = [0, 64], sizes = [2, 32], strides = [1, 1]} : vector<2x128xf32> to vector<2x32xf32>
    %178 = arith.mulf %167, %177 : vector<2x32xf32>
    %179 = arith.addf %176, %178 : vector<2x32xf32>
    %180 = math.tanh %179 : vector<2x32xf32>
    %cst_55 = arith.constant 1.000000e+00 : f32
    %181 = vector.broadcast %cst_55 : f32 to vector<2x32xf32>
    %182 = arith.subf %181, %175 : vector<2x32xf32>
    %183 = arith.mulf %182, %180 : vector<2x32xf32>
    %184 = arith.mulf %175, %85 : vector<2x32xf32>
    %185 = arith.addf %183, %184 : vector<2x32xf32>
    %cst_56 = arith.constant dense<0.000000e+00> : vector<2x128xf32>
    %186 = tpu.matmul %185, %7, %cst_56 {dimension_numbers = #tpu.dot_dimension_numbers<[1], [0], [0], [1], [0, 0, 1, 1], [], []>} : vector<2x32xf32>, vector<32x128xf32>, vector<2x128xf32> -> vector<2x128xf32>
    %187 = vector.broadcast %9 : vector<1x128xf32> to vector<2x128xf32>
    %188 = arith.addf %186, %187 : vector<2x128xf32>
    %cst_57 = arith.constant dense<0.000000e+00> : vector<2x128xf32>
    %189 = tpu.matmul %117, %8, %cst_57 {dimension_numbers = #tpu.dot_dimension_numbers<[1], [0], [0], [1], [0, 0, 1, 1], [], []>} : vector<2x32xf32>, vector<32x128xf32>, vector<2x128xf32> -> vector<2x128xf32>
    %190 = vector.broadcast %10 : vector<1x128xf32> to vector<2x128xf32>
    %191 = arith.addf %189, %190 : vector<2x128xf32>
    %192 = vector.extract_strided_slice %188 {offsets = [0, 0], sizes = [2, 32], strides = [1, 1]} : vector<2x128xf32> to vector<2x32xf32>
    %193 = vector.extract_strided_slice %191 {offsets = [0, 0], sizes = [2, 32], strides = [1, 1]} : vector<2x128xf32> to vector<2x32xf32>
    %194 = arith.addf %192, %193 : vector<2x32xf32>
    %195 = arith.negf %194 : vector<2x32xf32>
    %196 = math.exp %195 : vector<2x32xf32>
    %cst_58 = arith.constant 1.000000e+00 : f32
    %197 = vector.broadcast %cst_58 : f32 to vector<2x32xf32>
    %198 = arith.addf %197, %196 : vector<2x32xf32>
    %199 = arith.divf %197, %198 : vector<2x32xf32>
    %200 = vector.extract_strided_slice %188 {offsets = [0, 32], sizes = [2, 32], strides = [1, 1]} : vector<2x128xf32> to vector<2x32xf32>
    %201 = vector.extract_strided_slice %191 {offsets = [0, 32], sizes = [2, 32], strides = [1, 1]} : vector<2x128xf32> to vector<2x32xf32>
    %202 = arith.addf %200, %201 : vector<2x32xf32>
    %203 = arith.negf %202 : vector<2x32xf32>
    %204 = math.exp %203 : vector<2x32xf32>
    %cst_59 = arith.constant 1.000000e+00 : f32
    %205 = vector.broadcast %cst_59 : f32 to vector<2x32xf32>
    %206 = arith.addf %205, %204 : vector<2x32xf32>
    %207 = arith.divf %205, %206 : vector<2x32xf32>
    %208 = vector.extract_strided_slice %188 {offsets = [0, 64], sizes = [2, 32], strides = [1, 1]} : vector<2x128xf32> to vector<2x32xf32>
    %209 = vector.extract_strided_slice %191 {offsets = [0, 64], sizes = [2, 32], strides = [1, 1]} : vector<2x128xf32> to vector<2x32xf32>
    %210 = arith.mulf %199, %209 : vector<2x32xf32>
    %211 = arith.addf %208, %210 : vector<2x32xf32>
    %212 = math.tanh %211 : vector<2x32xf32>
    %cst_60 = arith.constant 1.000000e+00 : f32
    %213 = vector.broadcast %cst_60 : f32 to vector<2x32xf32>
    %214 = arith.subf %213, %207 : vector<2x32xf32>
    %215 = arith.mulf %214, %212 : vector<2x32xf32>
    %216 = arith.mulf %207, %117 : vector<2x32xf32>
    %217 = arith.addf %215, %216 : vector<2x32xf32>
    %cst_61 = arith.constant dense<0.000000e+00> : vector<2x128xf32>
    %218 = tpu.matmul %217, %11, %cst_61 {dimension_numbers = #tpu.dot_dimension_numbers<[1], [0], [0], [1], [0, 0, 1, 1], [], []>} : vector<2x32xf32>, vector<32x128xf32>, vector<2x128xf32> -> vector<2x128xf32>
    %cst_62 = arith.constant dense<0.000000e+00> : vector<2x128xf32>
    %219 = tpu.matmul %153, %12, %cst_62 {dimension_numbers = #tpu.dot_dimension_numbers<[1], [0], [0], [1], [0, 0, 1, 1], [], []>} : vector<2x128xf32>, vector<128x128xf32>, vector<2x128xf32> -> vector<2x128xf32>
    %220 = arith.addf %218, %219 : vector<2x128xf32>
    %221 = vector.broadcast %13 : vector<1x128xf32> to vector<2x128xf32>
    %222 = arith.addf %220, %221 : vector<2x128xf32>
    %223 = arith.index_cast %c1_i32 : i32 to index
    %c0_63 = arith.constant 0 : index
    %c0_64 = arith.constant 0 : index
    %224 = vector.load %arg5[%223, %c0_63, %c0_64] : memref<4x2x128xf32, #tpu.memory_space<vmem>>, vector<1x2x128xf32>
    %225 = vector.shape_cast %224 : vector<1x2x128xf32> to vector<2x128xf32>
    %226 = vector.shape_cast %222 : vector<2x128xf32> to vector<1x2x128xf32>
    tpu.vector_store %arg5[%223, %c0_63, %c0_64], %226 {strides = array<i32>} : memref<4x2x128xf32, #tpu.memory_space<vmem>>, vector<1x2x128xf32>,
    %c2_i32 = arith.constant 2 : i32
    %227 = arith.index_cast %c2_i32 : i32 to index
    %c0_65 = arith.constant 0 : index
    %c0_66 = arith.constant 0 : index
    %228 = vector.load %arg0[%227, %c0_65, %c0_66] : memref<4x2x128xf32, #tpu.memory_space<vmem>>, vector<1x2x128xf32>
    %229 = vector.shape_cast %228 : vector<1x2x128xf32> to vector<2x128xf32>
    %cst_67 = arith.constant dense<0.000000e+00> : vector<2x128xf32>
    %230 = tpu.matmul %217, %1, %cst_67 {dimension_numbers = #tpu.dot_dimension_numbers<[1], [0], [0], [1], [0, 0, 1, 1], [], []>} : vector<2x32xf32>, vector<32x128xf32>, vector<2x128xf32> -> vector<2x128xf32>
    %231 = vector.shape_cast %230 : vector<2x128xf32> to vector<2x1x128xf32>
    %232 = vector.broadcast %231 : vector<2x1x128xf32> to vector<2x8x128xf32>
    %233 = arith.addf %21, %232 : vector<2x8x128xf32>
    %234 = math.tanh %233 : vector<2x8x128xf32>
    %235 = vector.shape_cast %2 : vector<1x128xf32> to vector<1x1x128xf32>
    %236 = vector.broadcast %235 : vector<1x1x128xf32> to vector<2x8x128xf32>
    %237 = arith.mulf %234, %236 : vector<2x8x128xf32>
    %cst_68 = arith.constant dense<0.000000e+00> : vector<2x8xf32>
    %238 = vector.multi_reduction <add>, %237, %cst_68 [2] : vector<2x8x128xf32> to vector<2x8xf32>
    %239 = arith.addf %238, %14 : vector<2x8xf32>
    %cst_69 = arith.constant dense<0xFF800000> : vector<2xf32>
    %240 = vector.multi_reduction <maximumf>, %239, %cst_69 [1] : vector<2x8xf32> to vector<2xf32>
    %241 = vector.shape_cast %240 : vector<2xf32> to vector<2x1xf32>
    %242 = vector.broadcast %241 : vector<2x1xf32> to vector<2x8xf32>
    %243 = arith.subf %239, %242 : vector<2x8xf32>
    %244 = math.exp %243 : vector<2x8xf32>
    %cst_70 = arith.constant dense<0.000000e+00> : vector<2xf32>
    %245 = vector.multi_reduction <add>, %244, %cst_70 [1] : vector<2x8xf32> to vector<2xf32>
    %246 = vector.shape_cast %245 : vector<2xf32> to vector<2x1xf32>
    %247 = vector.broadcast %246 : vector<2x1xf32> to vector<2x8xf32>
    %248 = arith.divf %244, %247 : vector<2x8xf32>
    %249 = vector.shape_cast %248 : vector<2x8xf32> to vector<2x8x1xf32>
    %250 = vector.broadcast %249 : vector<2x8x1xf32> to vector<2x8x128xf32>
    %251 = arith.mulf %250, %0 : vector<2x8x128xf32>
    %cst_71 = arith.constant dense<0.000000e+00> : vector<2x128xf32>
    %252 = vector.multi_reduction <add>, %251, %cst_71 [1] : vector<2x8x128xf32> to vector<2x128xf32>
    %253 = arith.addf %229, %252 : vector<2x128xf32>
    %cst_72 = arith.constant dense<0.000000e+00> : vector<2x128xf32>
    %254 = tpu.matmul %253, %3, %cst_72 {dimension_numbers = #tpu.dot_dimension_numbers<[1], [0], [0], [1], [0, 0, 1, 1], [], []>} : vector<2x128xf32>, vector<128x128xf32>, vector<2x128xf32> -> vector<2x128xf32>
    %255 = vector.broadcast %5 : vector<1x128xf32> to vector<2x128xf32>
    %256 = arith.addf %254, %255 : vector<2x128xf32>
    %cst_73 = arith.constant dense<0.000000e+00> : vector<2x128xf32>
    %257 = tpu.matmul %185, %4, %cst_73 {dimension_numbers = #tpu.dot_dimension_numbers<[1], [0], [0], [1], [0, 0, 1, 1], [], []>} : vector<2x32xf32>, vector<32x128xf32>, vector<2x128xf32> -> vector<2x128xf32>
    %258 = vector.broadcast %6 : vector<1x128xf32> to vector<2x128xf32>
    %259 = arith.addf %257, %258 : vector<2x128xf32>
    %260 = vector.extract_strided_slice %256 {offsets = [0, 0], sizes = [2, 32], strides = [1, 1]} : vector<2x128xf32> to vector<2x32xf32>
    %261 = vector.extract_strided_slice %259 {offsets = [0, 0], sizes = [2, 32], strides = [1, 1]} : vector<2x128xf32> to vector<2x32xf32>
    %262 = arith.addf %260, %261 : vector<2x32xf32>
    %263 = arith.negf %262 : vector<2x32xf32>
    %264 = math.exp %263 : vector<2x32xf32>
    %cst_74 = arith.constant 1.000000e+00 : f32
    %265 = vector.broadcast %cst_74 : f32 to vector<2x32xf32>
    %266 = arith.addf %265, %264 : vector<2x32xf32>
    %267 = arith.divf %265, %266 : vector<2x32xf32>
    %268 = vector.extract_strided_slice %256 {offsets = [0, 32], sizes = [2, 32], strides = [1, 1]} : vector<2x128xf32> to vector<2x32xf32>
    %269 = vector.extract_strided_slice %259 {offsets = [0, 32], sizes = [2, 32], strides = [1, 1]} : vector<2x128xf32> to vector<2x32xf32>
    %270 = arith.addf %268, %269 : vector<2x32xf32>
    %271 = arith.negf %270 : vector<2x32xf32>
    %272 = math.exp %271 : vector<2x32xf32>
    %cst_75 = arith.constant 1.000000e+00 : f32
    %273 = vector.broadcast %cst_75 : f32 to vector<2x32xf32>
    %274 = arith.addf %273, %272 : vector<2x32xf32>
    %275 = arith.divf %273, %274 : vector<2x32xf32>
    %276 = vector.extract_strided_slice %256 {offsets = [0, 64], sizes = [2, 32], strides = [1, 1]} : vector<2x128xf32> to vector<2x32xf32>
    %277 = vector.extract_strided_slice %259 {offsets = [0, 64], sizes = [2, 32], strides = [1, 1]} : vector<2x128xf32> to vector<2x32xf32>
    %278 = arith.mulf %267, %277 : vector<2x32xf32>
    %279 = arith.addf %276, %278 : vector<2x32xf32>
    %280 = math.tanh %279 : vector<2x32xf32>
    %cst_76 = arith.constant 1.000000e+00 : f32
    %281 = vector.broadcast %cst_76 : f32 to vector<2x32xf32>
    %282 = arith.subf %281, %275 : vector<2x32xf32>
    %283 = arith.mulf %282, %280 : vector<2x32xf32>
    %284 = arith.mulf %275, %185 : vector<2x32xf32>
    %285 = arith.addf %283, %284 : vector<2x32xf32>
    %cst_77 = arith.constant dense<0.000000e+00> : vector<2x128xf32>
    %286 = tpu.matmul %285, %7, %cst_77 {dimension_numbers = #tpu.dot_dimension_numbers<[1], [0], [0], [1], [0, 0, 1, 1], [], []>} : vector<2x32xf32>, vector<32x128xf32>, vector<2x128xf32> -> vector<2x128xf32>
    %287 = vector.broadcast %9 : vector<1x128xf32> to vector<2x128xf32>
    %288 = arith.addf %286, %287 : vector<2x128xf32>
    %cst_78 = arith.constant dense<0.000000e+00> : vector<2x128xf32>
    %289 = tpu.matmul %217, %8, %cst_78 {dimension_numbers = #tpu.dot_dimension_numbers<[1], [0], [0], [1], [0, 0, 1, 1], [], []>} : vector<2x32xf32>, vector<32x128xf32>, vector<2x128xf32> -> vector<2x128xf32>
    %290 = vector.broadcast %10 : vector<1x128xf32> to vector<2x128xf32>
    %291 = arith.addf %289, %290 : vector<2x128xf32>
    %292 = vector.extract_strided_slice %288 {offsets = [0, 0], sizes = [2, 32], strides = [1, 1]} : vector<2x128xf32> to vector<2x32xf32>
    %293 = vector.extract_strided_slice %291 {offsets = [0, 0], sizes = [2, 32], strides = [1, 1]} : vector<2x128xf32> to vector<2x32xf32>
    %294 = arith.addf %292, %293 : vector<2x32xf32>
    %295 = arith.negf %294 : vector<2x32xf32>
    %296 = math.exp %295 : vector<2x32xf32>
    %cst_79 = arith.constant 1.000000e+00 : f32
    %297 = vector.broadcast %cst_79 : f32 to vector<2x32xf32>
    %298 = arith.addf %297, %296 : vector<2x32xf32>
    %299 = arith.divf %297, %298 : vector<2x32xf32>
    %300 = vector.extract_strided_slice %288 {offsets = [0, 32], sizes = [2, 32], strides = [1, 1]} : vector<2x128xf32> to vector<2x32xf32>
    %301 = vector.extract_strided_slice %291 {offsets = [0, 32], sizes = [2, 32], strides = [1, 1]} : vector<2x128xf32> to vector<2x32xf32>
    %302 = arith.addf %300, %301 : vector<2x32xf32>
    %303 = arith.negf %302 : vector<2x32xf32>
    %304 = math.exp %303 : vector<2x32xf32>
    %cst_80 = arith.constant 1.000000e+00 : f32
    %305 = vector.broadcast %cst_80 : f32 to vector<2x32xf32>
    %306 = arith.addf %305, %304 : vector<2x32xf32>
    %307 = arith.divf %305, %306 : vector<2x32xf32>
    %308 = vector.extract_strided_slice %288 {offsets = [0, 64], sizes = [2, 32], strides = [1, 1]} : vector<2x128xf32> to vector<2x32xf32>
    %309 = vector.extract_strided_slice %291 {offsets = [0, 64], sizes = [2, 32], strides = [1, 1]} : vector<2x128xf32> to vector<2x32xf32>
    %310 = arith.mulf %299, %309 : vector<2x32xf32>
    %311 = arith.addf %308, %310 : vector<2x32xf32>
    %312 = math.tanh %311 : vector<2x32xf32>
    %cst_81 = arith.constant 1.000000e+00 : f32
    %313 = vector.broadcast %cst_81 : f32 to vector<2x32xf32>
    %314 = arith.subf %313, %307 : vector<2x32xf32>
    %315 = arith.mulf %314, %312 : vector<2x32xf32>
    %316 = arith.mulf %307, %217 : vector<2x32xf32>
    %317 = arith.addf %315, %316 : vector<2x32xf32>
    %cst_82 = arith.constant dense<0.000000e+00> : vector<2x128xf32>
    %318 = tpu.matmul %317, %11, %cst_82 {dimension_numbers = #tpu.dot_dimension_numbers<[1], [0], [0], [1], [0, 0, 1, 1], [], []>} : vector<2x32xf32>, vector<32x128xf32>, vector<2x128xf32> -> vector<2x128xf32>
    %cst_83 = arith.constant dense<0.000000e+00> : vector<2x128xf32>
    %319 = tpu.matmul %253, %12, %cst_83 {dimension_numbers = #tpu.dot_dimension_numbers<[1], [0], [0], [1], [0, 0, 1, 1], [], []>} : vector<2x128xf32>, vector<128x128xf32>, vector<2x128xf32> -> vector<2x128xf32>
    %320 = arith.addf %318, %319 : vector<2x128xf32>
    %321 = vector.broadcast %13 : vector<1x128xf32> to vector<2x128xf32>
    %322 = arith.addf %320, %321 : vector<2x128xf32>
    %323 = arith.index_cast %c2_i32 : i32 to index
    %c0_84 = arith.constant 0 : index
    %c0_85 = arith.constant 0 : index
    %324 = vector.load %arg5[%323, %c0_84, %c0_85] : memref<4x2x128xf32, #tpu.memory_space<vmem>>, vector<1x2x128xf32>
    %325 = vector.shape_cast %324 : vector<1x2x128xf32> to vector<2x128xf32>
    %326 = vector.shape_cast %322 : vector<2x128xf32> to vector<1x2x128xf32>
    tpu.vector_store %arg5[%323, %c0_84, %c0_85], %326 {strides = array<i32>} : memref<4x2x128xf32, #tpu.memory_space<vmem>>, vector<1x2x128xf32>,
    %c3_i32 = arith.constant 3 : i32
    %327 = arith.index_cast %c3_i32 : i32 to index
    %c0_86 = arith.constant 0 : index
    %c0_87 = arith.constant 0 : index
    %328 = vector.load %arg0[%327, %c0_86, %c0_87] : memref<4x2x128xf32, #tpu.memory_space<vmem>>, vector<1x2x128xf32>
    %329 = vector.shape_cast %328 : vector<1x2x128xf32> to vector<2x128xf32>
    %cst_88 = arith.constant dense<0.000000e+00> : vector<2x128xf32>
    %330 = tpu.matmul %317, %1, %cst_88 {dimension_numbers = #tpu.dot_dimension_numbers<[1], [0], [0], [1], [0, 0, 1, 1], [], []>} : vector<2x32xf32>, vector<32x128xf32>, vector<2x128xf32> -> vector<2x128xf32>
    %331 = vector.shape_cast %330 : vector<2x128xf32> to vector<2x1x128xf32>
    %332 = vector.broadcast %331 : vector<2x1x128xf32> to vector<2x8x128xf32>
    %333 = arith.addf %21, %332 : vector<2x8x128xf32>
    %334 = math.tanh %333 : vector<2x8x128xf32>
    %335 = vector.shape_cast %2 : vector<1x128xf32> to vector<1x1x128xf32>
    %336 = vector.broadcast %335 : vector<1x1x128xf32> to vector<2x8x128xf32>
    %337 = arith.mulf %334, %336 : vector<2x8x128xf32>
    %cst_89 = arith.constant dense<0.000000e+00> : vector<2x8xf32>
    %338 = vector.multi_reduction <add>, %337, %cst_89 [2] : vector<2x8x128xf32> to vector<2x8xf32>
    %339 = arith.addf %338, %14 : vector<2x8xf32>
    %cst_90 = arith.constant dense<0xFF800000> : vector<2xf32>
    %340 = vector.multi_reduction <maximumf>, %339, %cst_90 [1] : vector<2x8xf32> to vector<2xf32>
    %341 = vector.shape_cast %340 : vector<2xf32> to vector<2x1xf32>
    %342 = vector.broadcast %341 : vector<2x1xf32> to vector<2x8xf32>
    %343 = arith.subf %339, %342 : vector<2x8xf32>
    %344 = math.exp %343 : vector<2x8xf32>
    %cst_91 = arith.constant dense<0.000000e+00> : vector<2xf32>
    %345 = vector.multi_reduction <add>, %344, %cst_91 [1] : vector<2x8xf32> to vector<2xf32>
    %346 = vector.shape_cast %345 : vector<2xf32> to vector<2x1xf32>
    %347 = vector.broadcast %346 : vector<2x1xf32> to vector<2x8xf32>
    %348 = arith.divf %344, %347 : vector<2x8xf32>
    %349 = vector.shape_cast %348 : vector<2x8xf32> to vector<2x8x1xf32>
    %350 = vector.broadcast %349 : vector<2x8x1xf32> to vector<2x8x128xf32>
    %351 = arith.mulf %350, %0 : vector<2x8x128xf32>
    %cst_92 = arith.constant dense<0.000000e+00> : vector<2x128xf32>
    %352 = vector.multi_reduction <add>, %351, %cst_92 [1] : vector<2x8x128xf32> to vector<2x128xf32>
    %353 = arith.addf %329, %352 : vector<2x128xf32>
    %cst_93 = arith.constant dense<0.000000e+00> : vector<2x128xf32>
    %354 = tpu.matmul %353, %3, %cst_93 {dimension_numbers = #tpu.dot_dimension_numbers<[1], [0], [0], [1], [0, 0, 1, 1], [], []>} : vector<2x128xf32>, vector<128x128xf32>, vector<2x128xf32> -> vector<2x128xf32>
    %355 = vector.broadcast %5 : vector<1x128xf32> to vector<2x128xf32>
    %356 = arith.addf %354, %355 : vector<2x128xf32>
    %cst_94 = arith.constant dense<0.000000e+00> : vector<2x128xf32>
    %357 = tpu.matmul %285, %4, %cst_94 {dimension_numbers = #tpu.dot_dimension_numbers<[1], [0], [0], [1], [0, 0, 1, 1], [], []>} : vector<2x32xf32>, vector<32x128xf32>, vector<2x128xf32> -> vector<2x128xf32>
    %358 = vector.broadcast %6 : vector<1x128xf32> to vector<2x128xf32>
    %359 = arith.addf %357, %358 : vector<2x128xf32>
    %360 = vector.extract_strided_slice %356 {offsets = [0, 0], sizes = [2, 32], strides = [1, 1]} : vector<2x128xf32> to vector<2x32xf32>
    %361 = vector.extract_strided_slice %359 {offsets = [0, 0], sizes = [2, 32], strides = [1, 1]} : vector<2x128xf32> to vector<2x32xf32>
    %362 = arith.addf %360, %361 : vector<2x32xf32>
    %363 = arith.negf %362 : vector<2x32xf32>
    %364 = math.exp %363 : vector<2x32xf32>
    %cst_95 = arith.constant 1.000000e+00 : f32
    %365 = vector.broadcast %cst_95 : f32 to vector<2x32xf32>
    %366 = arith.addf %365, %364 : vector<2x32xf32>
    %367 = arith.divf %365, %366 : vector<2x32xf32>
    %368 = vector.extract_strided_slice %356 {offsets = [0, 32], sizes = [2, 32], strides = [1, 1]} : vector<2x128xf32> to vector<2x32xf32>
    %369 = vector.extract_strided_slice %359 {offsets = [0, 32], sizes = [2, 32], strides = [1, 1]} : vector<2x128xf32> to vector<2x32xf32>
    %370 = arith.addf %368, %369 : vector<2x32xf32>
    %371 = arith.negf %370 : vector<2x32xf32>
    %372 = math.exp %371 : vector<2x32xf32>
    %cst_96 = arith.constant 1.000000e+00 : f32
    %373 = vector.broadcast %cst_96 : f32 to vector<2x32xf32>
    %374 = arith.addf %373, %372 : vector<2x32xf32>
    %375 = arith.divf %373, %374 : vector<2x32xf32>
    %376 = vector.extract_strided_slice %356 {offsets = [0, 64], sizes = [2, 32], strides = [1, 1]} : vector<2x128xf32> to vector<2x32xf32>
    %377 = vector.extract_strided_slice %359 {offsets = [0, 64], sizes = [2, 32], strides = [1, 1]} : vector<2x128xf32> to vector<2x32xf32>
    %378 = arith.mulf %367, %377 : vector<2x32xf32>
    %379 = arith.addf %376, %378 : vector<2x32xf32>
    %380 = math.tanh %379 : vector<2x32xf32>
    %cst_97 = arith.constant 1.000000e+00 : f32
    %381 = vector.broadcast %cst_97 : f32 to vector<2x32xf32>
    %382 = arith.subf %381, %375 : vector<2x32xf32>
    %383 = arith.mulf %382, %380 : vector<2x32xf32>
    %384 = arith.mulf %375, %285 : vector<2x32xf32>
    %385 = arith.addf %383, %384 : vector<2x32xf32>
    %cst_98 = arith.constant dense<0.000000e+00> : vector<2x128xf32>
    %386 = tpu.matmul %385, %7, %cst_98 {dimension_numbers = #tpu.dot_dimension_numbers<[1], [0], [0], [1], [0, 0, 1, 1], [], []>} : vector<2x32xf32>, vector<32x128xf32>, vector<2x128xf32> -> vector<2x128xf32>
    %387 = vector.broadcast %9 : vector<1x128xf32> to vector<2x128xf32>
    %388 = arith.addf %386, %387 : vector<2x128xf32>
    %cst_99 = arith.constant dense<0.000000e+00> : vector<2x128xf32>
    %389 = tpu.matmul %317, %8, %cst_99 {dimension_numbers = #tpu.dot_dimension_numbers<[1], [0], [0], [1], [0, 0, 1, 1], [], []>} : vector<2x32xf32>, vector<32x128xf32>, vector<2x128xf32> -> vector<2x128xf32>
    %390 = vector.broadcast %10 : vector<1x128xf32> to vector<2x128xf32>
    %391 = arith.addf %389, %390 : vector<2x128xf32>
    %392 = vector.extract_strided_slice %388 {offsets = [0, 0], sizes = [2, 32], strides = [1, 1]} : vector<2x128xf32> to vector<2x32xf32>
    %393 = vector.extract_strided_slice %391 {offsets = [0, 0], sizes = [2, 32], strides = [1, 1]} : vector<2x128xf32> to vector<2x32xf32>
    %394 = arith.addf %392, %393 : vector<2x32xf32>
    %395 = arith.negf %394 : vector<2x32xf32>
    %396 = math.exp %395 : vector<2x32xf32>
    %cst_100 = arith.constant 1.000000e+00 : f32
    %397 = vector.broadcast %cst_100 : f32 to vector<2x32xf32>
    %398 = arith.addf %397, %396 : vector<2x32xf32>
    %399 = arith.divf %397, %398 : vector<2x32xf32>
    %400 = vector.extract_strided_slice %388 {offsets = [0, 32], sizes = [2, 32], strides = [1, 1]} : vector<2x128xf32> to vector<2x32xf32>
    %401 = vector.extract_strided_slice %391 {offsets = [0, 32], sizes = [2, 32], strides = [1, 1]} : vector<2x128xf32> to vector<2x32xf32>
    %402 = arith.addf %400, %401 : vector<2x32xf32>
    %403 = arith.negf %402 : vector<2x32xf32>
    %404 = math.exp %403 : vector<2x32xf32>
    %cst_101 = arith.constant 1.000000e+00 : f32
    %405 = vector.broadcast %cst_101 : f32 to vector<2x32xf32>
    %406 = arith.addf %405, %404 : vector<2x32xf32>
    %407 = arith.divf %405, %406 : vector<2x32xf32>
    %408 = vector.extract_strided_slice %388 {offsets = [0, 64], sizes = [2, 32], strides = [1, 1]} : vector<2x128xf32> to vector<2x32xf32>
    %409 = vector.extract_strided_slice %391 {offsets = [0, 64], sizes = [2, 32], strides = [1, 1]} : vector<2x128xf32> to vector<2x32xf32>
    %410 = arith.mulf %399, %409 : vector<2x32xf32>
    %411 = arith.addf %408, %410 : vector<2x32xf32>
    %412 = math.tanh %411 : vector<2x32xf32>
    %cst_102 = arith.constant 1.000000e+00 : f32
    %413 = vector.broadcast %cst_102 : f32 to vector<2x32xf32>
    %414 = arith.subf %413, %407 : vector<2x32xf32>
    %415 = arith.mulf %414, %412 : vector<2x32xf32>
    %416 = arith.mulf %407, %317 : vector<2x32xf32>
    %417 = arith.addf %415, %416 : vector<2x32xf32>
    %cst_103 = arith.constant dense<0.000000e+00> : vector<2x128xf32>
    %418 = tpu.matmul %417, %11, %cst_103 {dimension_numbers = #tpu.dot_dimension_numbers<[1], [0], [0], [1], [0, 0, 1, 1], [], []>} : vector<2x32xf32>, vector<32x128xf32>, vector<2x128xf32> -> vector<2x128xf32>
    %cst_104 = arith.constant dense<0.000000e+00> : vector<2x128xf32>
    %419 = tpu.matmul %353, %12, %cst_104 {dimension_numbers = #tpu.dot_dimension_numbers<[1], [0], [0], [1], [0, 0, 1, 1], [], []>} : vector<2x128xf32>, vector<128x128xf32>, vector<2x128xf32> -> vector<2x128xf32>
    %420 = arith.addf %418, %419 : vector<2x128xf32>
    %421 = vector.broadcast %13 : vector<1x128xf32> to vector<2x128xf32>
    %422 = arith.addf %420, %421 : vector<2x128xf32>
    %423 = arith.index_cast %c3_i32 : i32 to index
    %c0_105 = arith.constant 0 : index
    %c0_106 = arith.constant 0 : index
    %424 = vector.load %arg5[%423, %c0_105, %c0_106] : memref<4x2x128xf32, #tpu.memory_space<vmem>>, vector<1x2x128xf32>
    %425 = vector.shape_cast %424 : vector<1x2x128xf32> to vector<2x128xf32>
    %426 = vector.shape_cast %422 : vector<2x128xf32> to vector<1x2x128xf32>
    tpu.vector_store %arg5[%423, %c0_105, %c0_106], %426 {strides = array<i32>} : memref<4x2x128xf32, #tpu.memory_space<vmem>>, vector<1x2x128xf32>,
    %c4_i32 = arith.constant 4 : i32
    %c0_107 = arith.constant 0 : index
    %c0_108 = arith.constant 0 : index
    %c0_109 = arith.constant 0 : index
    %427 = vector.load %arg6[%c0_107, %c0_108, %c0_109] : memref<2x2x32xf32, #tpu.memory_space<vmem>>, vector<1x2x32xf32>
    %428 = vector.shape_cast %427 : vector<1x2x32xf32> to vector<2x32xf32>
    %429 = vector.shape_cast %385 : vector<2x32xf32> to vector<1x2x32xf32>
    tpu.vector_store %arg6[%c0_107, %c0_108, %c0_109], %429 {strides = array<i32>} : memref<2x2x32xf32, #tpu.memory_space<vmem>>, vector<1x2x32xf32>,
    %c1 = arith.constant 1 : index
    %c0_110 = arith.constant 0 : index
    %c0_111 = arith.constant 0 : index
    %430 = vector.load %arg6[%c1, %c0_110, %c0_111] : memref<2x2x32xf32, #tpu.memory_space<vmem>>, vector<1x2x32xf32>
    %431 = vector.shape_cast %430 : vector<1x2x32xf32> to vector<2x32xf32>
    %432 = vector.shape_cast %417 : vector<2x32xf32> to vector<1x2x32xf32>
    tpu.vector_store %arg6[%c1, %c0_110, %c0_111], %432 {strides = array<i32>} : memref<2x2x32xf32, #tpu.memory_space<vmem>>, vector<1x2x32xf32>,
    return
  }
}

</mosaic_0001>

<bundles_post_ra>
// kernel: decoder_decode.1
= control target key start
LH: loop header
LB: loop body
LE: loop exit
PB: predicated region body
PF: predicated region fallthrough
CT: control target
= control target key end

     0   :  { %12 = vsyncpa [#allocation3], 0  ;;  %v5393_v5 = vmov 0.0|0.0   ;;  %vm4434_vm0 = vmmov 0   ;;  %v4435_v6 = vmov 0.0   ;;  %s5386_s0 = inlined_call_operand.vmem [shape: f32[4,2,128], index: 0, kind: input, shape index: {}]   ;;  %s5387_s1 = inlined_call_operand.vmem [shape: f32[2,2,32], index: 1, kind: input, shape index: {}]   ;;  %s5388_s2 = inlined_call_operand.vmem [shape: f32[2,8,128], index: 2, kind: input, shape index: {}]   ;;  %s5389_s3 = inlined_call_operand.vmem [shape: f32[2,8], index: 3, kind: input, shape index: {}]   ;;  %s5390_s4 = inlined_call_operand.vmem [shape: f32[600,128], index: 4, kind: input, shape index: {}]   ;;  %s5391_s5 = inlined_call_operand.hbm [shape: f32[4,2,128], index: 5, kind: output, shape index: {0}]   ;;  %s5392_s6 = inlined_call_operand.hbm [shape: f32[2,2,32], index: 6, kind: output, shape index: {1}]  }
   0x1   :  { %v85_v0 = vld [vmem:[%s5390_s4 + $0x20] sm:$0xff]  ;;  %v86_v1 = vld [vmem:[%s5390_s4 + $0x28] sm:$0xff]  ;;  %v87_v2 = vld [vmem:[%s5390_s4 + $0x30] sm:$0xff]  ;;  %3962 = vmatprep.subr.bf16.mxu1 %v5393_v5  ;;  %3467 = vmatprep.mubr.msk.f32.mxu1 %vm4434_vm0, %v4435_v6 }
   0x2   :  { %v3924_v3 = vpack.c.bf16 %v86_v1, %v85_v0  ;;  %v88_v4 = vld [vmem:[%s5390_s4 + $0x38] sm:$0xff]  ;;  %v89_v8 = vld [vmem:[%s5390_s4 + $0x40] sm:$0xff]  ;;  %v90_v9 = vld [vmem:[%s5390_s4 + $0x48] sm:$0xff] }
   0x3   :  { %v3928_v7 = vpack.c.bf16 %v88_v4, %v87_v2  ;;  %v3932_v10 = vpack.c.bf16 %v90_v9, %v89_v8  ;;  %v4503_v11 = vld [vmem:[%s5388_s2] sm:$0xff]  ;;  %v91_v12 = vld [vmem:[%s5390_s4 + $0x50] sm:$0xff]  ;;  %v92_v13 = vld [vmem:[%s5390_s4 + $0x58] sm:$0xff] }
   0x4   :  { %3925 = vmatprep.subr.bf16.mxu0 %v3924_v3  ;;  %3421 = vmatprep.mubr.f32.mxu0 %v4503_v11 }
   0x5   :  { %3927 = vmatpush3.bf16.msra.mxu0 %v3924_v3 }
   0x6   :  { %3929 = vmatprep.subr.bf16.mxu0 %v3928_v7 }
   0x7   :  { %13 = vsyncpa [#allocation5], 0  ;;  %v3936_v14 = vpack.c.bf16 %v92_v13, %v91_v12  ;;  %v93_v15 = vld [vmem:[%s5390_s4 + $0x60] sm:$0xff]  ;;  %v94_v16 = vld [vmem:[%s5390_s4 + $0x68] sm:$0xff]  ;;  %vm184_vm1 = vcmask 261120   ;;  %v262_v35 = vlaneseq  ;;  %v4437_v4 = vmov 0  }
   0x8   :  { %v3940_v17 = vpack.c.bf16 %v94_v16, %v93_v15  ;;  %v95_v18 = vld [vmem:[%s5390_s4 + $0x70] sm:$0xff]  ;;  %v96_v19 = vld [vmem:[%s5390_s4 + $0x78] sm:$0xff]  ;;  %v97_v21 = vld [vmem:[%s5390_s4 + $0x80] sm:$0xff]  ;;  %v4436_v44 = vmov 1966171168   ;;  %4279 = vset.pattern.permute.xlu0 %v4437_v4  ;;  %4280 = vset.pattern.permute.xlu1 %v4437_v4  ;;  %vm342_vm2 = vcmask 1041409  }
   0x9   :  { %3931 = vmatpush3.bf16.msra.mxu0 %v3928_v7  ;;  %v3944_v20 = vpack.c.bf16 %v96_v19, %v95_v18  ;;  %v98_v22 = vld [vmem:[%s5390_s4 + $0x88] sm:$0xff]  ;;  %v99_v24 = vld [vmem:[%s5390_s4 + $0x90] sm:$0xff]  ;;  %v100_v25 = vld [vmem:[%s5390_s4 + $0x98] sm:$0xff]  ;;  %v263_v36 = vshrl.u32 %v262_v35, 7  ;;  %v333_v37 = vand.u32 127, %v262_v35  ;;  %v260_v45 = vunpack.c.l.s4 %v4436_v44  ;;  %s4438_s18 = smov 64  }
   0xa   :  { %3933 = vmatprep.subr.bf16.mxu0 %v3932_v10  ;;  %v3948_v23 = vpack.c.bf16 %v98_v22, %v97_v21  ;;  %v3952_v26 = vpack.c.bf16 %v100_v25, %v99_v24  ;;  %v26_v27 = vld [vmem:[%s5390_s4] sm:$0xff]  ;;  %v27_v28 = vld [vmem:[%s5390_s4 + $0x8] sm:$0xff]  ;;  %v28_v31 = vld [vmem:[%s5390_s4 + $0x10] sm:$0xff]  ;;  %vm345_vm3 = vcmask 58368   ;;  %s4439_s13 = smov 96   ;;  %s4440_s14 = smov 32  }
   0xb   :  { %v4545_v29 = vld [vmem:[%s5388_s2 + $0x8] sm:$0xff]  ;;  %v4547_v30 = vpack.c.bf16 %v27_v28, %v26_v27  ;;  %v29_v32 = vld [vmem:[%s5390_s4 + $0x18] sm:$0xff]  ;;  %v4567_v34 = vld [vmem:[%s5387_s1 + $0x2] sm:$0x3]  ;;  %v4574_v38 = vsub.s32 %v333_v37, %v263_v36  ;;  %v4576_v39 = vsub.s32 0, %v263_v36  ;;  %v4581_v41 = vsub.s32 1, %v263_v36 }
   0xc   :  { %v4558_v33 = vpack.c.bf16 %v29_v32, %v28_v31  ;;  %v84_v40 = vld [vmem:[%s5389_s3] sm:$0x3]  ;;  %v261_v48 = vunpack.c.0.s8 %v260_v45  ;;  %v4604_v63 = vld [vmem:[%s5390_s4 + $0xa8] ss:$0 sm:$0xff]  ;;  %vm3060_vm4 = vcmask 254976  }
   0xd   :  { %3935 = vmatpush3.bf16.msra.mxu0 %v3932_v10  ;;  %v309_v42 = vrot.slane %v84_v40, %v4576_v39  ;;  %v316_v43 = vrot.slane %v84_v40, %v4581_v41  ;;  %v3097_v53 = vld [vmem:[%s5390_s4 + $0xa0] ss:$0 sm:$0xff] }
   0xe   :  { %3937 = vmatprep.subr.bf16.mxu0 %v3936_v14  ;;  %v4585_v49 = vsub.s32 %v261_v48, %v263_v36  ;;  %v49_v44 = vld [vmem:[%s5390_s4 + $0x140] sm:$0xff]  ;;  %v32_v48 = vld [vmem:[%s5390_s4 + $0xb8] sm:$0xff] }
   0xf   :  { %311 = vbcast.lane.b32.xlu1 %v309_v42, 256  ;;  %v47_v42 = vld [vmem:[%s5390_s4 + $0x130] sm:$0xff]  ;;  %v37_v4 = vld [vmem:[%s5390_s4 + $0xe0] sm:$0xff] }
  0x11   :  { %3939 = vmatpush3.bf16.msra.mxu0 %v3936_v14 }
  0x12   :  { %3941 = vmatprep.subr.bf16.mxu0 %v3940_v17 }
  0x13   :  { %318 = vbcast.lane.b32.xlu1 %v316_v43, 256  ;;  %v48_v43 = vld [vmem:[%s5390_s4 + $0x138] sm:$0xff] }
  0x14   :  { %v4633_v45 = vpack.c.bf16 %v48_v43, %v47_v42 }
  0x15   :  { %3943 = vmatpush3.bf16.msra.mxu0 %v3940_v17 }
  0x16   :  { %3945 = vmatprep.subr.bf16.mxu0 %v3944_v20 }
  0x19   :  { %3947 = vmatpush3.bf16.msra.mxu0 %v3944_v20 }
  0x1a   :  { %3949 = vmatprep.subr.bf16.mxu0 %v3948_v23 }
  0x1d   :  { %3951 = vmatpush3.bf16.msra.mxu0 %v3948_v23 }
  0x1e   :  { %3953 = vmatprep.subr.bf16.mxu0 %v3952_v26 }
  0x21   :  { %3955 = vmatpush3.bf16.msra.mxu0 %v3952_v26 }
  0x22   :  { %3956 = vmatprep.subr.bf16.mxu0 %v5393_v5 }
  0x24   :  { %3422 = vmatmul.mubr.f32.vlgmr.msra.gmra.mrb[0].mxu0 %v4545_v29 }
  0x25   :  { %3958 = vmatpush3.bf16.msra.mxu0 %v4547_v30  ;;  %3432 = vmatprep.mubr.msk.f32.mxu0 %vm4434_vm0, %v4435_v6 }
  0x26   :  { %3959 = vmatprep.subr.bf16.mxu0 %v5393_v5 }
  0x29   :  { %3961 = vmatpush3.bf16.msra.mxu0 %v4558_v33 }
  0x2a   :  { %3986 = vmatprep.subr.bf16.mxu0 %v5393_v5 }
  0x2c   :  { %3433 = vmatmul.mubr.msk.f32.vlgmr.msra.gmra.mrb[2].mxu0 %vm184_vm1, %v4567_v34 }
  0x2d   :  { %3478 = vmatprep.mubr.msk.f32.mxu0 %vm4434_vm0, %v4435_v6  ;;  %3988 = vmatpush3.bf16.msra.mxu0 %v4633_v45 }
  0x2e   :  { %3989 = vmatprep.subr.bf16.mxu0 %v5393_v5 }
  0x81   :  { %v4608_v7 = vpop.permute.xlu1 %311 }
  0x85   :  { %v4611_v10 = vpop.permute.xlu1 %318 }
  0xf7   :  { %v3423_v46 = vpop.f32.mrb[0].mxu0 }
  0xf8   :  { %v172_v47 = vpop.f32.mrb[1].mxu0  ;;  %v4596_v59 = vadd.f32 %v3423_v46, %v3097_v53  ;;  %v50_v46 = vld [vmem:[%s5390_s4 + $0x148] sm:$0xff] }
  0xf9   :  { %v4592_v56 = vadd.f32 %v3097_v53, %v172_v47  ;;  %v31_v47 = vld [vmem:[%s5390_s4 + $0xb0] sm:$0xff] }
  0xfa   :  { %v4653_v53 = vpack.c.bf16 %v32_v48, %v31_v47 }
  0xfc   :  { %3964 = vmatpush3.bf16.msra.mxu1 %v4653_v53 }
  0xfd   :  { %3965 = vmatprep.subr.bf16.mxu1 %v5393_v5 }
  0xff   :  { %v254_v50 = vpop.f32.mrb[2].mxu0 }
 0x100   :  { %v265_v51 = vrot.slane %v254_v50, %v4585_v49  ;;  %v3434_v52 = vpop.f32.mrb[3].mxu0  ;;  %v33_v50 = vld [vmem:[%s5390_s4 + $0xc0] sm:$0xff] }
 0x101   :  { %v4651_v52 = vpack.c.bf16 %v50_v46, %v49_v44 }
 0x102   :  { %v266_v54 = vcombine.high %v265_v51, %v265_v51  ;;  %v273_v55 = vrot.slane %v265_v51, %v4585_v49  ;;  %v34_v51 = vld [vmem:[%s5390_s4 + $0xc8] sm:$0xff] }
 0x103   :  { %3991 = vmatpush3.bf16.msra.mxu0 %v4651_v52 }
 0x104   :  { %v280_v57 = vrot.slane %v266_v54, %v4585_v49  ;;  %v284_v58 = vrot.slane %v273_v55, %v4576_v39  ;;  %v4657_v54 = vpack.c.bf16 %v34_v51, %v33_v50  ;;  %v35_v55 = vld [vmem:[%s5390_s4 + $0xd0] sm:$0xff]  ;;  %3992 = vmatprep.subr.bf16.mxu0 %v5393_v5 }
 0x106   :  { %v288_v60 = vrot.slane %v280_v57, %v4576_v39  ;;  %v291_v61 = vadd.f32 %v284_v58, %v4592_v56  ;;  %v36_v57 = vld [vmem:[%s5390_s4 + $0xd8] sm:$0xff]  ;;  %v4670_v58 = vld [vmem:[%s5387_s1] sm:$0x3]  ;;  %3967 = vmatpush3.bf16.msra.mxu1 %v4657_v54 }
 0x107   :  { %3479 = vmatmul.mubr.msk.f32.vlgmr.msra.gmra.mrb[4].mxu0 %vm184_vm1, %v4670_v58  ;;  %3968 = vmatprep.subr.bf16.mxu1 %v5393_v5 }
 0x108   :  { %v292_v62 = vadd.f32 %v288_v60, %v4596_v59  ;;  %4281 = vtanh.f32 %v291_v61  ;;  %v4674_v60 = vpack.c.bf16 %v36_v57, %v35_v55  ;;  %3489 = vmatprep.mubr.msk.f32.mxu0 %vm4434_vm0, %v4435_v6 }
 0x10a   :  { %4283 = vtanh.f32 %v292_v62  ;;  %3970 = vmatpush3.bf16.msra.mxu1 %v4674_v60 }
 0x10b   :  { %3971 = vmatprep.subr.bf16.mxu1 %v5393_v5 }
 0x112   :  { %v4282_v0 = vpop.eup %4281 }
 0x113   :  { %v299_v1 = vmul.f32 %v4282_v0, %v4604_v63 }
 0x114   :  { %v4284_v2 = vpop.eup %4283 }
 0x115   :  { %301 = vadd.xlane.f32.xlu0 %v299_v1  ;;  %v300_v3 = vmul.f32 %v4284_v2, %v4604_v63 }
 0x119   :  { %303 = vadd.xlane.f32.xlu0 %v300_v3 }
 0x1a2   :  { %v302_v8 = vpop.xlane.xlu0 %301 }
 0x1a3   :  { %v322_v9 = vadd.f32 %v4608_v7, %v302_v8  ;;  %v38_v8 = vld [vmem:[%s5390_s4 + $0xe8] sm:$0xff] }
 0x1a5   :  { %327 = vperm.xlu0 %4279, %v322_v9  }
 0x1a6   :  { %v304_v12 = vpop.xlane.xlu0 %303 }
 0x1a7   :  { %v323_v13 = vadd.f32 %v4611_v10, %v304_v12 }
 0x1a9   :  { %330 = vperm.xlu1 %4280, %v323_v13  }
 0x224   :  { %v328_v14 = vpop.permute.xlu0 %327 }
 0x225   :  { %v337_v16 = vrot.slane %v328_v14, %v4574_v38  ;;  %v40_v14 = vld [vmem:[%s5390_s4 + $0xf8] sm:$0xff] }
 0x228   :  { %v331_v15 = vpop.permute.xlu1 %330 }
 0x229   :  { %v341_v17 = vrot.slane %v331_v15, %v4574_v38 }
 0x22b   :  { %v343_v18 = vsel %vm342_vm2, %v341_v17, %v337_v16  ;;  %v41_v16 = vld [vmem:[%s5390_s4 + $0x100] sm:$0xff]  ;;  %v42_v17 = vld [vmem:[%s5390_s4 + $0x108] sm:$0xff] }
 0x22c   :  { %v346_v19 = vsel %vm345_vm3, %v343_v18, -inf  ;;  %v4711_v18 = vpack.c.bf16 %v42_v17, %v41_v16 }
 0x22d   :  { %347 = vmax.xlane.f32.xlu1 %v346_v19  ;;  %v43_v19 = vld [vmem:[%s5390_s4 + $0x110] sm:$0xff] }
 0x2ba   :  { %v348_v20 = vpop.xlane.xlu1 %347 }
 0x2bb   :  { %v353_v21 = vrot.slane %v348_v20, %v4576_v39  ;;  %v357_v22 = vrot.slane %v348_v20, %v4581_v41  ;;  %v44_v20 = vld [vmem:[%s5390_s4 + $0x118] sm:$0xff] }
 0x2bd   :  { %v360_v23 = vsub.f32 %v322_v9, %v353_v21  ;;  %v361_v24 = vsub.f32 %v323_v13, %v357_v22  ;;  %v4691_v9 = vpack.c.bf16 %v38_v8, %v37_v4  ;;  %v39_v13 = vld [vmem:[%s5390_s4 + $0xf0] sm:$0xff]  ;;  %v4721_v21 = vpack.c.bf16 %v44_v20, %v43_v19  ;;  %v45_v22 = vld [vmem:[%s5390_s4 + $0x120] sm:$0xff] }
 0x2be   :  { %v4701_v15 = vpack.c.bf16 %v40_v14, %v39_v13 }
 0x2bf   :  { %v362_v25 = vmul.f32 1.442695, %v360_v23  ;;  %v364_v26 = vmul.f32 1.442695, %v361_v24  ;;  %3973 = vmatpush3.bf16.msra.mxu1 %v4691_v9  ;;  %v46_v23 = vld [vmem:[%s5390_s4 + $0x128] sm:$0xff] }
 0x2c0   :  { %3974 = vmatprep.subr.bf16.mxu1 %v5393_v5  ;;  %v4731_v24 = vpack.c.bf16 %v46_v23, %v45_v22  ;;  %v57_v23 = vld [vmem:[%s5390_s4 + $0x180] sm:$0xff] }
 0x2c1   :  { %4285 = vpow2.f32 %v362_v25  ;;  %v4738_v25 = vld [vmem:[%s5390_s4 + $0x158] ss:$0 sm:$0xff] }
 0x2c2   :  { %4287 = vpow2.f32 %v364_v26  ;;  %v578_v26 = vpop.f32.mrb[4].mxu0 }
 0x2c3   :  { %3976 = vmatpush3.bf16.msra.mxu1 %v4701_v15 }
 0x2c4   :  { %3977 = vmatprep.subr.bf16.mxu1 %v5393_v5 }
 0x2c7   :  { %3979 = vmatpush3.bf16.msra.mxu1 %v4711_v18 }
 0x2c8   :  { %3980 = vmatprep.subr.bf16.mxu1 %v5393_v5 }
 0x2cb   :  { %v4286_v27 = vpop.eup %4285  ;;  %3982 = vmatpush3.bf16.msra.mxu1 %v4721_v21 }
 0x2cc   :  { %v4288_v28 = vpop.eup %4287  ;;  %369 = vperm.xlu1 %4280, %v4286_v27   ;;  %3983 = vmatprep.subr.bf16.mxu1 %v5393_v5 }
 0x2cd   :  { %372 = vperm.xlu0 %4279, %v4288_v28  }
 0x2cf   :  { %3985 = vmatpush3.bf16.msra.mxu1 %v4731_v24 }
 0x2d0   :  { %3998 = vmatprep.subr.bf16.mxu1 %v5393_v5 }
 0x34b   :  { %v370_v31 = vpop.permute.xlu1 %369 }
 0x34c   :  { %v373_v32 = vpop.permute.xlu0 %372  ;;  %v377_v35 = vrot.slane %v370_v31, %v4574_v38 }
 0x34d   :  { %v381_v36 = vrot.slane %v373_v32, %v4574_v38 }
 0x34f   :  { %v382_v37 = vsel %vm342_vm2, %v381_v36, %v377_v35 }
 0x350   :  { %v384_v40 = vsel %vm345_vm3, %v382_v37, 0.0 }
 0x351   :  { %385 = vadd.xlane.f32.xlu0 %v384_v40 }
 0x3de   :  { %v386_v61 = vpop.xlane.xlu0 %385 }
 0x3df   :  { %v391_v62 = vrot.slane %v386_v61, %v4576_v39  ;;  %v395_v0 = vrot.slane %v386_v61, %v4581_v41  ;;  %v183_v61 = vld [vmem:[%s5386_s0] sm:$0x3] }
 0x3e1   :  { %4289 = vrcp.f32 %v391_v62 }
 0x3e2   :  { %4291 = vrcp.f32 %v395_v0 }
 0x3eb   :  { %v4290_v1 = vpop.eup %4289 }
 0x3ec   :  { %v399_v2 = vmul.f32 %v4290_v1, %v4286_v27  ;;  %v4292_v3 = vpop.eup %4291  ;;  %v579_v27 = vadd.f32 %v4738_v25, %v578_v26  ;;  %v4756_v1 = vld [vmem:[%s5390_s4 + $0x150] ss:$0 sm:$0xff]  ;;  %v58_v26 = vld [vmem:[%s5390_s4 + $0x188] sm:$0xff] }
 0x3ed   :  { %v401_v12 = vmul.f32 %v4292_v3, %v4288_v28  ;;  %v3480_v28 = vpop.f32.mrb[5].mxu0 }
 0x3ee   :  { %404 = vperm.xlu1 %4280, %v399_v2   ;;  %v4769_v28 = vpack.c.bf16 %v58_v26, %v57_v23  ;;  %v75_v26 = vld [vmem:[%s5390_s4 + $0x210] sm:$0xff] }
 0x3f2   :  { %409 = vperm.xlu1 %4280, %v401_v12  }
 0x3f6   :  { %590 = vrot.lane.b32.xlu1 %v579_v27, %s4438_s18 }
 0x46d   :  { %v405_v31 = vpop.permute.xlu1 %404 }
 0x46e   :  { %v412_v32 = vmul.f32 %v405_v31, %v4503_v11  ;;  %v60_v31 = vld [vmem:[%s5390_s4 + $0x198] sm:$0xff] }
 0x470   :  { %v414_v35 = vrot.slane %v412_v32, 4 }
 0x471   :  { %v410_v36 = vpop.permute.xlu1 %409 }
 0x472   :  { %v415_v37 = vadd.f32 %v414_v35, %v412_v32  ;;  %v413_v40 = vmul.f32 %v410_v36, %v4545_v29  ;;  %v53_v32 = vld [vmem:[%s5390_s4 + $0x160] sm:$0xff]  ;;  %v54_v35 = vld [vmem:[%s5390_s4 + $0x168] sm:$0xff] }
 0x473   :  { %v4780_v36 = vpack.c.bf16 %v54_v35, %v53_v32  ;;  %v77_v32 = vld [vmem:[%s5390_s4 + $0x220] sm:$0xff]  ;;  %v78_v35 = vld [vmem:[%s5390_s4 + $0x228] sm:$0xff] }
 0x474   :  { %v416_v42 = vrot.slane %v415_v37, 2  ;;  %v420_v43 = vrot.slane %v413_v40, 4 }
 0x475   :  { %v591_v16 = vpop.permute.xlu1 %590  ;;  %3994 = vmatpush3.bf16.msra.mxu0 %v4780_v36 }
 0x476   :  { %v417_v44 = vadd.f32 %v416_v42, %v415_v37  ;;  %v421_v46 = vadd.f32 %v420_v43, %v413_v40  ;;  %v55_v37 = vld [vmem:[%s5390_s4 + $0x170] sm:$0xff]  ;;  %v56_v40 = vld [vmem:[%s5390_s4 + $0x178] sm:$0xff]  ;;  %3995 = vmatprep.subr.bf16.mxu0 %v5393_v5 }
 0x478   :  { %v422_v47 = vrot.slane %v421_v46, 2  ;;  %v418_v48 = vrot.slane %v417_v44, 1 }
 0x47a   :  { %v423_v50 = vadd.f32 %v422_v47, %v421_v46  ;;  %v419_v55 = vadd.f32 %v418_v48, %v417_v44  ;;  %v4793_v44 = vpack.c.bf16 %v56_v40, %v55_v37  ;;  %v4876_v37 = vpack.c.bf16 %v78_v35, %v77_v32  ;;  %v79_v40 = vld [vmem:[%s5390_s4 + $0x230] sm:$0xff] }
 0x47c   :  { %v424_v51 = vrot.slane %v423_v50, 1  ;;  %3997 = vmatpush3.bf16.msra.mxu0 %v4793_v44 }
 0x47d   :  { %4004 = vmatprep.subr.bf16.mxu0 %v5393_v5 }
 0x47e   :  { %v425_v57 = vadd.f32 %v424_v51, %v423_v50 }
 0x480   :  { %v428_v62 = vsel %vm342_vm2, %v425_v57, %v419_v55 }
 0x481   :  { %v4748_v0 = vadd.f32 %v428_v62, %v183_v61 }
 0x483   :  { %3468 = vmatmul.mubr.f32.vlgmr.msra.gmra.mrb[0].mxu1 %v4748_v0 }
 0x484   :  { %3500 = vmatprep.mubr.msk.f32.mxu1 %vm4434_vm0, %v4435_v6  ;;  %4000 = vmatpush3.bf16.msra.mxu1 %v4769_v28 }
 0x485   :  { %4001 = vmatprep.subr.bf16.mxu1 %v5393_v5 }
 0x556   :  { %v501_v2 = vpop.f32.mrb[0].mxu1 }
 0x557   :  { %v502_v3 = vadd.f32 %v4756_v1, %v501_v2  ;;  %v3469_v4 = vpop.f32.mrb[1].mxu1  ;;  %v67_v2 = vld [vmem:[%s5390_s4 + $0x1d0] sm:$0xff] }
 0x559   :  { %v582_v8 = vadd.f32 %v579_v27, %v502_v3  ;;  %v59_v27 = vld [vmem:[%s5390_s4 + $0x190] sm:$0xff] }
 0x55a   :  { %v4789_v42 = vpack.c.bf16 %v60_v31, %v59_v27  ;;  %v76_v27 = vld [vmem:[%s5390_s4 + $0x218] sm:$0xff] }
 0x55b   :  { %v3103_v12 = vmul.f32 -1.442695, %v582_v8  ;;  %v69_v8 = vld [vmem:[%s5390_s4 + $0x1e0] sm:$0xff]  ;;  %v4866_v31 = vpack.c.bf16 %v76_v27, %v75_v26 }
 0x55c   :  { %4003 = vmatpush3.bf16.msra.mxu1 %v4789_v42 }
 0x55d   :  { %4293 = vpow2.f32 %v3103_v12  ;;  %4028 = vmatprep.subr.bf16.mxu1 %v5393_v5  ;;  %v70_v12 = vld [vmem:[%s5390_s4 + $0x1e8] sm:$0xff] }
 0x55f   :  { %3501 = vmatmul.mubr.msk.f32.vlgmr.msra.gmra.mrb[2].mxu1 %vm184_vm1, %v4567_v34 }
 0x560   :  { %3546 = vmatprep.mubr.msk.f32.mxu1 %vm4434_vm0, %v4435_v6 }
 0x567   :  { %v4294_v13 = vpop.eup %4293 }
 0x568   :  { %v586_v14 = vadd.f32 1.0, %v4294_v13 }
 0x56a   :  { %4295 = vrcp.f32 %v586_v14  ;;  %v4834_v14 = vpack.c.bf16 %v70_v12, %v69_v8 }
 0x574   :  { %v4296_v17 = vpop.eup %4295 }
 0x575   :  { %v593_v19 = vmul.f32 %v4296_v17, %v591_v16  ;;  %v600_v47 = vsub.f32 1.0, %v4296_v17  ;;  %v71_v16 = vld [vmem:[%s5390_s4 + $0x1f0] sm:$0xff] }
 0x577   :  { %595 = vrot.lane.b32.xlu1 %v593_v19, %s4438_s18 }
 0x5e9   :  { %v596_v20 = vpop.permute.xlu1 %595 }
 0x5ea   :  { %v598_v22 = vadd.f32 %v596_v20, %v502_v3  ;;  %v68_v3 = vld [vmem:[%s5390_s4 + $0x1d8] sm:$0xff]  ;;  %v73_v20 = vld [vmem:[%s5390_s4 + $0x200] sm:$0xff] }
 0x5eb   :  { %v4824_v4 = vpack.c.bf16 %v68_v3, %v67_v2 }
 0x5ec   :  { %4297 = vtanh.f32 %v598_v22  ;;  %v74_v22 = vld [vmem:[%s5390_s4 + $0x208] sm:$0xff] }
 0x5ed   :  { %v4856_v23 = vpack.c.bf16 %v74_v22, %v73_v20 }
 0x5f6   :  { %v4298_v43 = vpop.eup %4297 }
 0x5f7   :  { %602 = vrot.lane.b32.xlu1 %v4298_v43, %s4439_s13  ;;  %v80_v43 = vld [vmem:[%s5390_s4 + $0x238] sm:$0xff] }
 0x5fb   :  { %606 = vrot.lane.b32.xlu1 %v4670_v58, %s4440_s14  ;;  %v4814_v58 = vld [vmem:[%s5390_s4 + $0x1a8] ss:$0 sm:$0xff] }
 0x632   :  { %v760_v57 = vpop.f32.mrb[2].mxu1 }
 0x633   :  { %v761_v61 = vadd.f32 %v4814_v58, %v760_v57  ;;  %v3502_v62 = vpop.f32.mrb[3].mxu1 }
 0x635   :  { %772 = vrot.lane.b32.xlu1 %v761_v61, %s4438_s18 }
 0x669   :  { %v603_v46 = vpop.permute.xlu1 %602 }
 0x66a   :  { %v605_v50 = vmul.f32 %v603_v46, %v600_v47  ;;  %v4886_v46 = vpack.c.bf16 %v80_v43, %v79_v40  ;;  %v81_v47 = vld [vmem:[%s5390_s4 + $0x240] sm:$0xff]  ;;  %v64_v40 = vld [vmem:[%s5390_s4 + $0x1b8] sm:$0xff] }
 0x66b   :  { %v65_v43 = vld [vmem:[%s5390_s4 + $0x1c0] sm:$0xff] }
 0x66d   :  { %v607_v48 = vpop.permute.xlu1 %606 }
 0x66e   :  { %v609_v51 = vmul.f32 %v4296_v17, %v607_v48  ;;  %v72_v17 = vld [vmem:[%s5390_s4 + $0x1f8] sm:$0xff]  ;;  %v82_v48 = vld [vmem:[%s5390_s4 + $0x248] sm:$0xff] }
 0x66f   :  { %v4846_v19 = vpack.c.bf16 %v72_v17, %v71_v16 }
 0x670   :  { %v4807_v55 = vadd.f32 %v609_v51, %v605_v50  ;;  %v4896_v50 = vpack.c.bf16 %v82_v48, %v81_v47  ;;  %v66_v48 = vld [vmem:[%s5390_s4 + $0x1c8] sm:$0xff] }
 0x672   :  { %616 = vrot.lane.b32.xlu0 %v4807_v55, %s4439_s13 }
 0x6e4   :  { %v617_v13 = vpop.permute.xlu0 %616 }
 0x6e5   :  { %3490 = vmatmul.mubr.msk.f32.vlgmr.msra.gmra.mrb[6].mxu0 %vm184_vm1, %v617_v13 }
 0x6e6   :  { %4006 = vmatpush3.bf16.msra.mxu0 %v4824_v4  ;;  %3535 = vmatprep.mubr.msk.f32.mxu0 %vm4434_vm0, %v4435_v6 }
 0x6e7   :  { %4007 = vmatprep.subr.bf16.mxu0 %v5393_v5 }
 0x6ea   :  { %4009 = vmatpush3.bf16.msra.mxu0 %v4834_v14 }
 0x6eb   :  { %4010 = vmatprep.subr.bf16.mxu0 %v5393_v5 }
 0x6ee   :  { %4012 = vmatpush3.bf16.msra.mxu0 %v4846_v19 }
 0x6ef   :  { %4013 = vmatprep.subr.bf16.mxu0 %v5393_v5 }
 0x6f2   :  { %4015 = vmatpush3.bf16.msra.mxu0 %v4856_v23 }
 0x6f3   :  { %4016 = vmatprep.subr.bf16.mxu0 %v5393_v5 }
 0x6f6   :  { %4018 = vmatpush3.bf16.msra.mxu0 %v4866_v31 }
 0x6f7   :  { %4019 = vmatprep.subr.bf16.mxu0 %v5393_v5 }
 0x6fa   :  { %4021 = vmatpush3.bf16.msra.mxu0 %v4876_v37 }
 0x6fb   :  { %4022 = vmatprep.subr.bf16.mxu0 %v5393_v5 }
 0x6fe   :  { %4024 = vmatpush3.bf16.msra.mxu0 %v4886_v46 }
 0x6ff   :  { %4025 = vmatprep.subr.bf16.mxu0 %v5393_v5 }
 0x702   :  { %4027 = vmatpush3.bf16.msra.mxu0 %v4896_v50 }
 0x703   :  { %4064 = vmatprep.subr.bf16.mxu0 %v5393_v5 }
 0x705   :  { %3536 = vmatmul.mubr.f32.vlgmr.msra.gmra.mrb[8].mxu0 %v4748_v0  ;;  %v4918_v0 = vld [vmem:[%s5390_s4 + $0x1a0] ss:$0 sm:$0xff] }
 0x706   :  { %4066 = vmatpush3.bf16.msra.mxu0 %v4633_v45  ;;  %3603 = vmatprep.mubr.msk.f32.mxu0 %vm4434_vm0, %v4435_v6 }
 0x707   :  { %4067 = vmatprep.subr.bf16.mxu0 %v5393_v5 }
 0x70a   :  { %4069 = vmatpush3.bf16.msra.mxu0 %v4651_v52 }
 0x70b   :  { %4070 = vmatprep.subr.bf16.mxu0 %v5393_v5 }
 0x70d   :  { %3604 = vmatmul.mubr.msk.f32.vlgmr.msra.gmra.mrb[10].mxu0 %vm184_vm1, %v617_v13  ;;  %v773_v13 = vpop.permute.xlu1 %772 }
 0x70e   :  { %4072 = vmatpush3.bf16.msra.mxu0 %v4780_v36  ;;  %3614 = vmatprep.mubr.msk.f32.mxu0 %vm4434_vm0, %v4435_v6 }
 0x70f   :  { %4073 = vmatprep.subr.bf16.mxu0 %v5393_v5 }
 0x712   :  { %4075 = vmatpush3.bf16.msra.mxu0 %v4793_v44 }
 0x713   :  { %4076 = vmatprep.subr.bf16.mxu0 %v5393_v5 }
 0x7b8   :  { %v686_v51 = vpop.f32.mrb[6].mxu0 }
 0x7b9   :  { %v687_v57 = vadd.f32 %v4918_v0, %v686_v51  ;;  %v3491_v62 = vpop.f32.mrb[7].mxu0  ;;  %v4939_v51 = vpack.c.bf16 %v66_v48, %v65_v43 }
 0x7bb   :  { %v764_v2 = vadd.f32 %v761_v61, %v687_v57  ;;  %v63_v61 = vld [vmem:[%s5390_s4 + $0x1b0] sm:$0xff] }
 0x7bc   :  { %v4933_v47 = vpack.c.bf16 %v64_v40, %v63_v61 }
 0x7bd   :  { %v3108_v3 = vmul.f32 -1.442695, %v764_v2 }
 0x7be   :  { %4030 = vmatpush3.bf16.msra.mxu1 %v4933_v47 }
 0x7bf   :  { %4299 = vpow2.f32 %v3108_v3  ;;  %4031 = vmatprep.subr.bf16.mxu1 %v5393_v5 }
 0x7c2   :  { %4033 = vmatpush3.bf16.msra.mxu1 %v4939_v51 }
 0x7c3   :  { %4034 = vmatprep.subr.bf16.mxu1 %v5393_v5 }
 0x7c9   :  { %v4300_v8 = vpop.eup %4299 }
 0x7ca   :  { %v768_v12 = vadd.f32 1.0, %v4300_v8 }
 0x7cc   :  { %4301 = vrcp.f32 %v768_v12 }
 0x7d6   :  { %v4302_v16 = vpop.eup %4301 }
 0x7d7   :  { %v775_v17 = vmul.f32 %v4302_v16, %v773_v13  ;;  %v782_v2 = vsub.f32 1.0, %v4302_v16 }
 0x7d8   :  { %v859_v20 = vpop.f32.mrb[8].mxu0 }
 0x7d9   :  { %v3537_v22 = vpop.f32.mrb[9].mxu0  ;;  %777 = vrot.lane.b32.xlu1 %v775_v17, %s4438_s18 }
 0x7e0   :  { %v4922_v26 = vpop.f32.mrb[10].mxu0 }
 0x7e1   :  { %v3605_v27 = vpop.f32.mrb[11].mxu0 }
 0x84b   :  { %v778_v32 = vpop.permute.xlu1 %777 }
 0x84c   :  { %v780_v35 = vadd.f32 %v778_v32, %v687_v57 }
 0x84e   :  { %4303 = vtanh.f32 %v780_v35 }
 0x858   :  { %v4304_v57 = vpop.eup %4303 }
 0x859   :  { %784 = vrot.lane.b32.xlu1 %v4304_v57, %s4439_s13 }
 0x85d   :  { %788 = vrot.lane.b32.xlu1 %v4567_v34, %s4440_s14  ;;  %v4984_v34 = vld [vmem:[%s5390_s4 + $0x250] ss:$0 sm:$0xff] }
 0x8cb   :  { %v785_v62 = vpop.permute.xlu1 %784 }
 0x8cc   :  { %v787_v8 = vmul.f32 %v785_v62, %v782_v2 }
 0x8cf   :  { %v789_v3 = vpop.permute.xlu1 %788 }
 0x8d0   :  { %v791_v12 = vmul.f32 %v4302_v16, %v789_v3 }
 0x8d2   :  { %v4947_v13 = vadd.f32 %v791_v12, %v787_v8 }
 0x8d4   :  { %864 = vrot.lane.b32.xlu1 %v4947_v13, %s4439_s13 }
 0x946   :  { %v4951_v17 = vpop.permute.xlu1 %864 }
 0x947   :  { %3547 = vmatmul.mubr.msk.f32.vlgmr.msra.gmra.mrb[4].mxu1 %vm184_vm1, %v4951_v17 }
 0x948   :  { %4036 = vmatpush3.bf16.msra.mxu1 %v4547_v30  ;;  %3557 = vmatprep.mubr.msk.f32.mxu1 %vm4434_vm0, %v4435_v6 }
 0x949   :  { %4037 = vmatprep.subr.bf16.mxu1 %v5393_v5 }
 0x94c   :  { %4039 = vmatpush3.bf16.msra.mxu1 %v4558_v33 }
 0x94d   :  { %4040 = vmatprep.subr.bf16.mxu1 %v5393_v5 }
 0x94f   :  { %3558 = vmatmul.mubr.msk.f32.vlgmr.msra.gmra.mrb[6].mxu1 %vm184_vm1, %v4951_v17 }
 0x950   :  { %4042 = vmatpush3.bf16.msra.mxu1 %v4653_v53  ;;  %3592 = vmatprep.mubr.msk.f32.mxu1 %vm4434_vm0, %v4435_v6 }
 0x951   :  { %4043 = vmatprep.subr.bf16.mxu1 %v5393_v5 }
 0x954   :  { %4045 = vmatpush3.bf16.msra.mxu1 %v4657_v54 }
 0x955   :  { %4046 = vmatprep.subr.bf16.mxu1 %v5393_v5 }
 0x958   :  { %4048 = vmatpush3.bf16.msra.mxu1 %v4674_v60 }
 0x959   :  { %4049 = vmatprep.subr.bf16.mxu1 %v5393_v5 }
 0x95c   :  { %4051 = vmatpush3.bf16.msra.mxu1 %v4691_v9 }
 0x95d   :  { %4052 = vmatprep.subr.bf16.mxu1 %v5393_v5 }
 0x960   :  { %4054 = vmatpush3.bf16.msra.mxu1 %v4701_v15 }
 0x961   :  { %4055 = vmatprep.subr.bf16.mxu1 %v5393_v5 }
 0x964   :  { %4057 = vmatpush3.bf16.msra.mxu1 %v4711_v18 }
 0x965   :  { %4058 = vmatprep.subr.bf16.mxu1 %v5393_v5 }
 0x968   :  { %4060 = vmatpush3.bf16.msra.mxu1 %v4721_v21 }
 0x969   :  { %4061 = vmatprep.subr.bf16.mxu1 %v5393_v5 }
 0x96c   :  { %4063 = vmatpush3.bf16.msra.mxu1 %v4731_v24 }
 0x96d   :  { %4082 = vmatprep.subr.bf16.mxu1 %v5393_v5 }
 0xa1a   :  { %v934_v16 = vpop.f32.mrb[4].mxu1 }
 0xa1b   :  { %v935_v22 = vadd.f32 %v934_v16, %v859_v20  ;;  %v3548_v27 = vpop.f32.mrb[5].mxu1 }
 0xa1d   :  { %v942_v32 = vadd.f32 %v4984_v34, %v935_v22 }
 0xa1f   :  { %943 = vst [vmem:[#allocation2] sm:$0x3] %v942_v32 }
 0xa22   :  { %v1012_v35 = vpop.f32.mrb[6].mxu1 }
 0xa23   :  { %v1023_v61 = vrot.slane %v1012_v35, %v4585_v49  ;;  %v3559_v40 = vpop.f32.mrb[7].mxu1 }
 0xa25   :  { %v1024_v43 = vcombine.high %v1023_v61, %v1023_v61  ;;  %v1031_v48 = vrot.slane %v1023_v61, %v4585_v49 }
 0xa27   :  { %v1038_v57 = vrot.slane %v1024_v43, %v4585_v49  ;;  %v1042_v62 = vrot.slane %v1031_v48, %v4576_v39 }
 0xa29   :  { %v1046_v2 = vrot.slane %v1038_v57, %v4576_v39  ;;  %v1049_v3 = vadd.f32 %v1042_v62, %v4592_v56 }
 0xa2b   :  { %v1050_v20 = vadd.f32 %v1046_v2, %v4596_v59  ;;  %4305 = vtanh.f32 %v1049_v3 }
 0xa2d   :  { %4307 = vtanh.f32 %v1050_v20 }
 0xa35   :  { %v4306_v8 = vpop.eup %4305 }
 0xa36   :  { %v1053_v12 = vmul.f32 %v4306_v8, %v4604_v63 }
 0xa37   :  { %v4308_v16 = vpop.eup %4307 }
 0xa38   :  { %1055 = vadd.xlane.f32.xlu0 %v1053_v12  ;;  %v1054_v22 = vmul.f32 %v4308_v16, %v4604_v63 }
 0xa3a   :  { %1057 = vadd.xlane.f32.xlu1 %v1054_v22 }
 0xac5   :  { %v1056_v27 = vpop.xlane.xlu0 %1055 }
 0xac6   :  { %v1059_v32 = vadd.f32 %v1056_v27, %v4608_v7 }
 0xac7   :  { %v1058_v35 = vpop.xlane.xlu1 %1057 }
 0xac8   :  { %v1060_v61 = vadd.f32 %v1058_v35, %v4611_v10  ;;  %1064 = vperm.xlu0 %4279, %v1059_v32  }
 0xaca   :  { %1067 = vperm.xlu1 %4280, %v1060_v61  }
 0xb47   :  { %v1065_v40 = vpop.permute.xlu0 %1064 }
 0xb48   :  { %v1072_v48 = vrot.slane %v1065_v40, %v4574_v38 }
 0xb49   :  { %v1068_v43 = vpop.permute.xlu1 %1067 }
 0xb4a   :  { %v1076_v57 = vrot.slane %v1068_v43, %v4574_v38 }
 0xb4c   :  { %v1077_v62 = vsel %vm342_vm2, %v1076_v57, %v1072_v48 }
 0xb4d   :  { %v1079_v2 = vsel %vm345_vm3, %v1077_v62, -inf }
 0xb4e   :  { %1080 = vmax.xlane.f32.xlu0 %v1079_v2 }
 0xbdb   :  { %v1081_v63 = vpop.xlane.xlu0 %1080 }
 0xbdc   :  { %v1086_v3 = vrot.slane %v1081_v63, %v4576_v39  ;;  %v1090_v20 = vrot.slane %v1081_v63, %v4581_v41 }
 0xbde   :  { %v1093_v8 = vsub.f32 %v1059_v32, %v1086_v3  ;;  %v1094_v12 = vsub.f32 %v1060_v61, %v1090_v20 }
 0xbe0   :  { %v1095_v16 = vmul.f32 1.442695, %v1093_v8  ;;  %v1097_v22 = vmul.f32 1.442695, %v1094_v12 }
 0xbe2   :  { %4309 = vpow2.f32 %v1095_v16  ;;  %v1301_v16 = vadd.f32 %v4738_v25, %v4922_v26 }
 0xbe3   :  { %4311 = vpow2.f32 %v1097_v22 }
 0xbec   :  { %v4310_v27 = vpop.eup %4309 }
 0xbed   :  { %1102 = vperm.xlu1 %4280, %v4310_v27   ;;  %v4312_v35 = vpop.eup %4311 }
 0xbf1   :  { %1105 = vperm.xlu1 %4280, %v4312_v35  }
 0xc6c   :  { %v1103_v40 = vpop.permute.xlu1 %1102 }
 0xc6d   :  { %v1110_v48 = vrot.slane %v1103_v40, %v4574_v38 }
 0xc70   :  { %v1106_v43 = vpop.permute.xlu1 %1105 }
 0xc71   :  { %v1114_v57 = vrot.slane %v1106_v43, %v4574_v38 }
 0xc73   :  { %v1115_v62 = vsel %vm342_vm2, %v1114_v57, %v1110_v48 }
 0xc74   :  { %v1117_v2 = vsel %vm345_vm3, %v1115_v62, 0.0 }
 0xc75   :  { %1118 = vadd.xlane.f32.xlu1 %v1117_v2 }
 0xd02   :  { %v1119_v32 = vpop.xlane.xlu1 %1118 }
 0xd03   :  { %v1124_v61 = vrot.slane %v1119_v32, %v4576_v39  ;;  %v1128_v63 = vrot.slane %v1119_v32, %v4581_v41 }
 0xd05   :  { %4313 = vrcp.f32 %v1124_v61 }
 0xd06   :  { %4315 = vrcp.f32 %v1128_v63 }
 0xd0f   :  { %v4314_v3 = vpop.eup %4313 }
 0xd10   :  { %v4316_v20 = vpop.eup %4315  ;;  %v1132_v8 = vmul.f32 %v4314_v3, %v4310_v27 }
 0xd11   :  { %v1134_v12 = vmul.f32 %v4316_v20, %v4312_v35 }
 0xd12   :  { %1137 = vperm.xlu0 %4279, %v1132_v8  }
 0xd13   :  { %1142 = vperm.xlu1 %4280, %v1134_v12   ;;  %v3111_v12 = vld [vmem:[%s5386_s0 + $0x2] sm:$0x3] }
 0xd16   :  { %1312 = vrot.lane.b32.xlu0 %v1301_v16, %s4438_s18 }
 0xd91   :  { %v1138_v22 = vpop.permute.xlu0 %1137 }
 0xd92   :  { %v1143_v40 = vpop.permute.xlu1 %1142  ;;  %v1145_v43 = vmul.f32 %v1138_v22, %v4503_v11 }
 0xd93   :  { %v1146_v48 = vmul.f32 %v1143_v40, %v4545_v29 }
 0xd94   :  { %v1147_v57 = vrot.slane %v1145_v43, 4 }
 0xd95   :  { %v1153_v62 = vrot.slane %v1146_v48, 4 }
 0xd96   :  { %v1148_v2 = vadd.f32 %v1147_v57, %v1145_v43 }
 0xd97   :  { %v1154_v32 = vadd.f32 %v1153_v62, %v1146_v48 }
 0xd98   :  { %v1149_v61 = vrot.slane %v1148_v2, 2 }
 0xd99   :  { %v1155_v27 = vrot.slane %v1154_v32, 2 }
 0xd9a   :  { %v1150_v35 = vadd.f32 %v1149_v61, %v1148_v2  ;;  %v1313_v61 = vpop.permute.xlu0 %1312 }
 0xd9b   :  { %v1156_v63 = vadd.f32 %v1155_v27, %v1154_v32 }
 0xd9c   :  { %v1151_v3 = vrot.slane %v1150_v35, 1 }
 0xd9d   :  { %v1157_v20 = vrot.slane %v1156_v63, 1 }
 0xd9e   :  { %v1152_v8 = vadd.f32 %v1151_v3, %v1150_v35 }
 0xd9f   :  { %v1158_v26 = vadd.f32 %v1157_v20, %v1156_v63 }
 0xda1   :  { %v1161_v11 = vsel %vm342_vm2, %v1158_v26, %v1152_v8 }
 0xda2   :  { %v1163_v22 = vadd.f32 %v3111_v12, %v1161_v11 }
 0xda4   :  { %3593 = vmatmul.mubr.f32.vlgmr.msra.gmra.mrb[8].mxu1 %v1163_v22 }
 0xda5   :  { %4084 = vmatpush3.bf16.msra.mxu1 %v4824_v4  ;;  %3660 = vmatprep.mubr.msk.f32.mxu1 %vm4434_vm0, %v4435_v6 }
 0xda6   :  { %4085 = vmatprep.subr.bf16.mxu1 %v5393_v5 }
 0xda9   :  { %4087 = vmatpush3.bf16.msra.mxu1 %v4834_v14 }
 0xdaa   :  { %4088 = vmatprep.subr.bf16.mxu1 %v5393_v5 }
 0xdad   :  { %4090 = vmatpush3.bf16.msra.mxu1 %v4846_v19 }
 0xdae   :  { %4091 = vmatprep.subr.bf16.mxu1 %v5393_v5 }
 0xdb1   :  { %4093 = vmatpush3.bf16.msra.mxu1 %v4856_v23 }
 0xdb2   :  { %4094 = vmatprep.subr.bf16.mxu1 %v5393_v5 }
 0xdb5   :  { %4096 = vmatpush3.bf16.msra.mxu1 %v4866_v31 }
 0xdb6   :  { %4097 = vmatprep.subr.bf16.mxu1 %v5393_v5 }
 0xdb9   :  { %4099 = vmatpush3.bf16.msra.mxu1 %v4876_v37 }
 0xdba   :  { %4100 = vmatprep.subr.bf16.mxu1 %v5393_v5 }
 0xdbd   :  { %4102 = vmatpush3.bf16.msra.mxu1 %v4886_v46 }
 0xdbe   :  { %4103 = vmatprep.subr.bf16.mxu1 %v5393_v5 }
 0xdc1   :  { %4105 = vmatpush3.bf16.msra.mxu1 %v4896_v50 }
 0xdc2   :  { %4142 = vmatprep.subr.bf16.mxu1 %v5393_v5 }
 0xdc4   :  { %3661 = vmatmul.mubr.f32.vlgmr.msra.gmra.mrb[10].mxu1 %v1163_v22 }
 0xdc5   :  { %4144 = vmatpush3.bf16.msra.mxu1 %v4633_v45  ;;  %3728 = vmatprep.mubr.msk.f32.mxu1 %vm4434_vm0, %v4435_v6 }
 0xdc6   :  { %4145 = vmatprep.subr.bf16.mxu1 %v5393_v5 }
 0xdc9   :  { %4147 = vmatpush3.bf16.msra.mxu1 %v4651_v52 }
 0xdca   :  { %4148 = vmatprep.subr.bf16.mxu1 %v5393_v5 }
 0xe77   :  { %v1230_v29 = vpop.f32.mrb[8].mxu1 }
 0xe78   :  { %v1231_v40 = vadd.f32 %v4756_v1, %v1230_v29  ;;  %v3594_v43 = vpop.f32.mrb[9].mxu1 }
 0xe7a   :  { %v1304_v48 = vadd.f32 %v1301_v16, %v1231_v40 }
 0xe7c   :  { %v3114_v57 = vmul.f32 -1.442695, %v1304_v48 }
 0xe7e   :  { %4317 = vpow2.f32 %v3114_v57 }
 0xe88   :  { %v4318_v62 = vpop.eup %4317 }
 0xe89   :  { %v1308_v2 = vadd.f32 1.0, %v4318_v62 }
 0xe8b   :  { %4319 = vrcp.f32 %v1308_v2 }
 0xe95   :  { %v4320_v32 = vpop.eup %4319 }
 0xe96   :  { %v1315_v27 = vmul.f32 %v4320_v32, %v1313_v61  ;;  %v1322_v16 = vsub.f32 1.0, %v4320_v32  ;;  %v1328_v12 = vmul.f32 %v4320_v32, %v4807_v55 }
 0xe97   :  { %v5044_v35 = vpop.f32.mrb[10].mxu1 }
 0xe98   :  { %v3662_v63 = vpop.f32.mrb[11].mxu1  ;;  %1317 = vrot.lane.b32.xlu0 %v1315_v27, %s4438_s18 }
 0xf0a   :  { %v1318_v3 = vpop.permute.xlu0 %1317 }
 0xf0b   :  { %v1320_v20 = vadd.f32 %v1318_v3, %v1231_v40 }
 0xf0d   :  { %4321 = vtanh.f32 %v1320_v20 }
 0xf17   :  { %v4322_v8 = vpop.eup %4321 }
 0xf18   :  { %1324 = vrot.lane.b32.xlu0 %v4322_v8, %s4439_s13 }
 0xf8a   :  { %v1325_v26 = vpop.permute.xlu0 %1324 }
 0xf8b   :  { %v1327_v11 = vmul.f32 %v1325_v26, %v1322_v16 }
 0xf8d   :  { %v5049_v22 = vadd.f32 %v1328_v12, %v1327_v11 }
 0xf8f   :  { %1331 = vrot.lane.b32.xlu1 %v5049_v22, %s4439_s13 }
0x1001   :  { %v1332_v29 = vpop.permute.xlu1 %1331 }
0x1002   :  { %3615 = vmatmul.mubr.msk.f32.vlgmr.msra.gmra.mrb[12].mxu0 %vm184_vm1, %v1332_v29  ;;  %3729 = vmatmul.mubr.msk.f32.vlgmr.msra.gmra.mrb[12].mxu1 %vm184_vm1, %v1332_v29 }
0x1003   :  { %4078 = vmatpush3.bf16.msra.mxu0 %v4769_v28  ;;  %3625 = vmatprep.mubr.msk.f32.mxu0 %vm4434_vm0, %v4435_v6 }
0x1004   :  { %4079 = vmatprep.subr.bf16.mxu0 %v5393_v5  ;;  %4150 = vmatpush3.bf16.msra.mxu1 %v4780_v36 }
0x1005   :  { %4151 = vmatprep.subr.bf16.mxu1 %v5393_v5  ;;  %3739 = vmatprep.mubr.msk.f32.mxu1 %vm4434_vm0, %v4435_v6 }
0x1007   :  { %4081 = vmatpush3.bf16.msra.mxu0 %v4789_v42 }
0x1008   :  { %4106 = vmatprep.subr.bf16.mxu0 %v5393_v5  ;;  %4153 = vmatpush3.bf16.msra.mxu1 %v4793_v44 }
0x1009   :  { %4154 = vmatprep.subr.bf16.mxu1 %v5393_v5 }
0x100a   :  { %3626 = vmatmul.mubr.msk.f32.vlgmr.msra.gmra.mrb[14].mxu0 %vm184_vm1, %v4951_v17 }
0x100b   :  { %4108 = vmatpush3.bf16.msra.mxu0 %v4933_v47  ;;  %3671 = vmatprep.mubr.msk.f32.mxu0 %vm4434_vm0, %v4435_v6 }
0x100c   :  { %4109 = vmatprep.subr.bf16.mxu0 %v5393_v5 }
0x100f   :  { %4111 = vmatpush3.bf16.msra.mxu0 %v4939_v51 }
0x1010   :  { %4112 = vmatprep.subr.bf16.mxu0 %v5393_v5 }
0x10d5   :  { %v1401_v55 = vpop.f32.mrb[12].mxu0  ;;  %v5075_v40 = vpop.f32.mrb[12].mxu1 }
0x10d6   :  { %v3616_v43 = vpop.f32.mrb[13].mxu0  ;;  %v3730_v48 = vpop.f32.mrb[13].mxu1  ;;  %v1402_v2 = vadd.f32 %v4918_v0, %v1401_v55 }
0x10dd   :  { %v1471_v57 = vpop.f32.mrb[14].mxu0 }
0x10de   :  { %v1472_v62 = vadd.f32 %v4814_v58, %v1471_v57  ;;  %v3627_v17 = vpop.f32.mrb[15].mxu0 }
0x10e0   :  { %1483 = vrot.lane.b32.xlu0 %v1472_v62, %s4438_s18  ;;  %v1475_v32 = vadd.f32 %v1472_v62, %v1402_v2 }
0x10e2   :  { %v3117_v61 = vmul.f32 -1.442695, %v1475_v32 }
0x10e4   :  { %4323 = vpow2.f32 %v3117_v61 }
0x10ee   :  { %v4324_v27 = vpop.eup %4323 }
0x10ef   :  { %v1479_v63 = vadd.f32 1.0, %v4324_v27 }
0x10f1   :  { %4325 = vrcp.f32 %v1479_v63 }
0x10fb   :  { %v4326_v3 = vpop.eup %4325 }
0x10fc   :  { %v1493_v11 = vsub.f32 1.0, %v4326_v3  ;;  %v1499_v55 = vmul.f32 %v4326_v3, %v4947_v13 }
0x1152   :  { %v1484_v20 = vpop.permute.xlu0 %1483 }
0x1153   :  { %v1486_v8 = vmul.f32 %v4326_v3, %v1484_v20 }
0x1155   :  { %1488 = vrot.lane.b32.xlu1 %v1486_v8, %s4438_s18 }
0x11c7   :  { %v1489_v16 = vpop.permute.xlu1 %1488 }
0x11c8   :  { %v1491_v26 = vadd.f32 %v1489_v16, %v1402_v2 }
0x11ca   :  { %4327 = vtanh.f32 %v1491_v26 }
0x11d4   :  { %v4328_v12 = vpop.eup %4327 }
0x11d5   :  { %1495 = vrot.lane.b32.xlu0 %v4328_v12, %s4439_s13 }
0x1247   :  { %v1496_v29 = vpop.permute.xlu0 %1495 }
0x1248   :  { %v1498_v43 = vmul.f32 %v1496_v29, %v1493_v11  ;;  %v5129_v11 = vld [vmem:[%s5390_s4 + $0xa8] ss:$0 sm:$0xff] }
0x124a   :  { %v5083_v48 = vadd.f32 %v1499_v55, %v1498_v43 }
0x124c   :  { %1572 = vrot.lane.b32.xlu1 %v5083_v48, %s4439_s13 }
0x12be   :  { %v5087_v57 = vpop.permute.xlu1 %1572 }
0x12bf   :  { %3672 = vmatmul.mubr.msk.f32.vlgmr.msra.gmra.mrb[16].mxu0 %vm184_vm1, %v5087_v57 }
0x12c0   :  { %4114 = vmatpush3.bf16.msra.mxu0 %v4547_v30  ;;  %3682 = vmatprep.mubr.msk.f32.mxu0 %vm4434_vm0, %v4435_v6 }
0x12c1   :  { %4115 = vmatprep.subr.bf16.mxu0 %v5393_v5 }
0x12c4   :  { %4117 = vmatpush3.bf16.msra.mxu0 %v4558_v33 }
0x12c5   :  { %4118 = vmatprep.subr.bf16.mxu0 %v5393_v5 }
0x12c7   :  { %3683 = vmatmul.mubr.msk.f32.vlgmr.msra.gmra.mrb[18].mxu0 %vm184_vm1, %v5087_v57 }
0x12c8   :  { %4120 = vmatpush3.bf16.msra.mxu0 %v4653_v53  ;;  %3717 = vmatprep.mubr.msk.f32.mxu0 %vm4434_vm0, %v4435_v6 }
0x12c9   :  { %4121 = vmatprep.subr.bf16.mxu0 %v5393_v5 }
0x12cc   :  { %4123 = vmatpush3.bf16.msra.mxu0 %v4657_v54 }
0x12cd   :  { %4124 = vmatprep.subr.bf16.mxu0 %v5393_v5 }
0x12d0   :  { %4126 = vmatpush3.bf16.msra.mxu0 %v4674_v60 }
0x12d1   :  { %4127 = vmatprep.subr.bf16.mxu0 %v5393_v5 }
0x12d4   :  { %4129 = vmatpush3.bf16.msra.mxu0 %v4691_v9 }
0x12d5   :  { %4130 = vmatprep.subr.bf16.mxu0 %v5393_v5 }
0x12d8   :  { %4132 = vmatpush3.bf16.msra.mxu0 %v4701_v15 }
0x12d9   :  { %4133 = vmatprep.subr.bf16.mxu0 %v5393_v5 }
0x12dc   :  { %4135 = vmatpush3.bf16.msra.mxu0 %v4711_v18 }
0x12dd   :  { %4136 = vmatprep.subr.bf16.mxu0 %v5393_v5 }
0x12e0   :  { %4138 = vmatpush3.bf16.msra.mxu0 %v4721_v21 }
0x12e1   :  { %4139 = vmatprep.subr.bf16.mxu0 %v5393_v5 }
0x12e4   :  { %4141 = vmatpush3.bf16.msra.mxu0 %v4731_v24 }
0x12e5   :  { %4160 = vmatprep.subr.bf16.mxu0 %v5393_v5 }
0x1392   :  { %v1642_v13 = vpop.f32.mrb[16].mxu0 }
0x1393   :  { %v1643_v62 = vadd.f32 %v1642_v13, %v5044_v35  ;;  %v3673_v17 = vpop.f32.mrb[17].mxu0 }
0x1395   :  { %v1646_v2 = vadd.f32 %v4984_v34, %v1643_v62 }
0x1397   :  { %1648 = vst [vmem:[#allocation2 + $0x2] sm:$0x3] %v1646_v2 }
0x139a   :  { %v1717_v32 = vpop.f32.mrb[18].mxu0 }
0x139b   :  { %v1728_v61 = vrot.slane %v1717_v32, %v4585_v49  ;;  %v3684_v27 = vpop.f32.mrb[19].mxu0 }
0x139d   :  { %v1729_v63 = vcombine.high %v1728_v61, %v1728_v61  ;;  %v1736_v3 = vrot.slane %v1728_v61, %v4585_v49 }
0x139f   :  { %v1743_v20 = vrot.slane %v1729_v63, %v4585_v49  ;;  %v1747_v8 = vrot.slane %v1736_v3, %v4576_v39 }
0x13a1   :  { %v1751_v16 = vrot.slane %v1743_v20, %v4576_v39  ;;  %v1754_v26 = vadd.f32 %v1747_v8, %v4592_v56 }
0x13a3   :  { %v1755_v35 = vadd.f32 %v1751_v16, %v4596_v59  ;;  %4329 = vtanh.f32 %v1754_v26 }
0x13a5   :  { %4331 = vtanh.f32 %v1755_v35 }
0x13ad   :  { %v4330_v12 = vpop.eup %4329 }
0x13ae   :  { %v1758_v29 = vmul.f32 %v5129_v11, %v4330_v12 }
0x13af   :  { %v4332_v55 = vpop.eup %4331 }
0x13b0   :  { %1760 = vadd.xlane.f32.xlu0 %v1758_v29  ;;  %v1759_v43 = vmul.f32 %v5129_v11, %v4332_v55 }
0x13b2   :  { %1762 = vadd.xlane.f32.xlu1 %v1759_v43 }
0x143d   :  { %v1761_v13 = vpop.xlane.xlu0 %1760 }
0x143e   :  { %v1764_v62 = vadd.f32 %v1761_v13, %v4608_v7 }
0x143f   :  { %v1763_v17 = vpop.xlane.xlu1 %1762 }
0x1440   :  { %v1765_v2 = vadd.f32 %v1763_v17, %v4611_v10  ;;  %1769 = vperm.xlu0 %4279, %v1764_v62  }
0x1442   :  { %1772 = vperm.xlu1 %4280, %v1765_v2  }
0x14bf   :  { %v1770_v32 = vpop.permute.xlu0 %1769 }
0x14c0   :  { %v1777_v27 = vrot.slane %v1770_v32, %v4574_v38 }
0x14c1   :  { %v1773_v61 = vpop.permute.xlu1 %1772 }
0x14c2   :  { %v1781_v63 = vrot.slane %v1773_v61, %v4574_v38 }
0x14c4   :  { %v1782_v3 = vsel %vm342_vm2, %v1781_v63, %v1777_v27 }
0x14c5   :  { %v1784_v20 = vsel %vm345_vm3, %v1782_v3, -inf }
0x14c6   :  { %1785 = vmax.xlane.f32.xlu0 %v1784_v20 }
0x1553   :  { %v1786_v8 = vpop.xlane.xlu0 %1785 }
0x1554   :  { %v1791_v16 = vrot.slane %v1786_v8, %v4576_v39  ;;  %v1795_v26 = vrot.slane %v1786_v8, %v4581_v41 }
0x1556   :  { %v1798_v35 = vsub.f32 %v1764_v62, %v1791_v16  ;;  %v1799_v12 = vsub.f32 %v1765_v2, %v1795_v26 }
0x1558   :  { %v1800_v29 = vmul.f32 1.442695, %v1798_v35  ;;  %v1802_v55 = vmul.f32 1.442695, %v1799_v12  ;;  %v2006_v12 = vadd.f32 %v4738_v25, %v5075_v40 }
0x155a   :  { %4333 = vpow2.f32 %v1800_v29 }
0x155b   :  { %4335 = vpow2.f32 %v1802_v55 }
0x1564   :  { %v4334_v43 = vpop.eup %4333 }
0x1565   :  { %1807 = vperm.xlu1 %4280, %v4334_v43   ;;  %v4336_v13 = vpop.eup %4335 }
0x1569   :  { %1810 = vperm.xlu1 %4280, %v4336_v13  }
0x15e4   :  { %v1808_v17 = vpop.permute.xlu1 %1807 }
0x15e5   :  { %v1815_v61 = vrot.slane %v1808_v17, %v4574_v38  ;;  %v5153_v17 = vld [vmem:[%s5388_s2] sm:$0xff] }
0x15e8   :  { %v1811_v32 = vpop.permute.xlu1 %1810 }
0x15e9   :  { %v1819_v27 = vrot.slane %v1811_v32, %v4574_v38 }
0x15eb   :  { %v1820_v63 = vsel %vm342_vm2, %v1819_v27, %v1815_v61 }
0x15ec   :  { %v1822_v3 = vsel %vm345_vm3, %v1820_v63, 0.0 }
0x15ed   :  { %1823 = vadd.xlane.f32.xlu1 %v1822_v3 }
0x167a   :  { %v1824_v62 = vpop.xlane.xlu1 %1823 }
0x167b   :  { %v1829_v2 = vrot.slane %v1824_v62, %v4576_v39  ;;  %v1833_v20 = vrot.slane %v1824_v62, %v4581_v41 }
0x167d   :  { %4337 = vrcp.f32 %v1829_v2 }
0x167e   :  { %4339 = vrcp.f32 %v1833_v20 }
0x1687   :  { %v4338_v8 = vpop.eup %4337 }
0x1688   :  { %v4340_v16 = vpop.eup %4339  ;;  %v1837_v26 = vmul.f32 %v4338_v8, %v4334_v43  ;;  %v5159_v43 = vld [vmem:[%s5388_s2 + $0x8] sm:$0xff] }
0x1689   :  { %v1839_v35 = vmul.f32 %v4340_v16, %v4336_v13 }
0x168a   :  { %1842 = vperm.xlu0 %4279, %v1837_v26  }
0x168b   :  { %1847 = vperm.xlu1 %4280, %v1839_v35   ;;  %v3119_v35 = vld [vmem:[%s5386_s0 + $0x4] sm:$0x3] }
0x168e   :  { %2017 = vrot.lane.b32.xlu0 %v2006_v12, %s4438_s18 }
0x1709   :  { %v1843_v29 = vpop.permute.xlu0 %1842 }
0x170a   :  { %v1848_v55 = vpop.permute.xlu1 %1847  ;;  %v1850_v32 = vmul.f32 %v5153_v17, %v1843_v29 }
0x170b   :  { %v1851_v13 = vmul.f32 %v5159_v43, %v1848_v55  ;;  %v5395_v55 = vmov 0.0|0.0  }
0x170c   :  { %v1852_v61 = vrot.slane %v1850_v32, 4 }
0x170d   :  { %v1858_v25 = vrot.slane %v1851_v13, 4 }
0x170e   :  { %v1853_v40 = vadd.f32 %v1852_v61, %v1850_v32 }
0x170f   :  { %v1859_v27 = vadd.f32 %v1858_v25, %v1851_v13 }
0x1710   :  { %v1854_v63 = vrot.slane %v1853_v40, 2 }
0x1711   :  { %v1860_v3 = vrot.slane %v1859_v27, 2 }
0x1712   :  { %v1855_v62 = vadd.f32 %v1854_v63, %v1853_v40  ;;  %v2018_v63 = vpop.permute.xlu0 %2017 }
0x1713   :  { %v1861_v2 = vadd.f32 %v1860_v3, %v1859_v27 }
0x1714   :  { %v1856_v20 = vrot.slane %v1855_v62, 1 }
0x1715   :  { %v1862_v8 = vrot.slane %v1861_v2, 1 }
0x1716   :  { %v1857_v16 = vadd.f32 %v1856_v20, %v1855_v62 }
0x1717   :  { %v1863_v26 = vadd.f32 %v1862_v8, %v1861_v2 }
0x1719   :  { %v1866_v29 = vsel %vm342_vm2, %v1863_v26, %v1857_v16 }
0x171a   :  { %v1868_v5 = vadd.f32 %v3119_v35, %v1866_v29 }
0x171c   :  { %3718 = vmatmul.mubr.f32.vlgmr.msra.gmra.mrb[20].mxu0 %v1868_v5 }
0x171d   :  { %4162 = vmatpush3.bf16.msra.mxu0 %v4824_v4  ;;  %3785 = vmatprep.mubr.msk.f32.mxu0 %vm4434_vm0, %v4435_v6 }
0x171e   :  { %4163 = vmatprep.subr.bf16.mxu0 %v5395_v55 }
0x1721   :  { %4165 = vmatpush3.bf16.msra.mxu0 %v4834_v14 }
0x1722   :  { %4166 = vmatprep.subr.bf16.mxu0 %v5395_v55 }
0x1725   :  { %4168 = vmatpush3.bf16.msra.mxu0 %v4846_v19 }
0x1726   :  { %4169 = vmatprep.subr.bf16.mxu0 %v5395_v55 }
0x1729   :  { %4171 = vmatpush3.bf16.msra.mxu0 %v4856_v23 }
0x172a   :  { %4172 = vmatprep.subr.bf16.mxu0 %v5395_v55 }
0x172d   :  { %4174 = vmatpush3.bf16.msra.mxu0 %v4866_v31 }
0x172e   :  { %4175 = vmatprep.subr.bf16.mxu0 %v5395_v55 }
0x1731   :  { %4177 = vmatpush3.bf16.msra.mxu0 %v4876_v37 }
0x1732   :  { %4178 = vmatprep.subr.bf16.mxu0 %v5395_v55 }
0x1735   :  { %4180 = vmatpush3.bf16.msra.mxu0 %v4886_v46 }
0x1736   :  { %4181 = vmatprep.subr.bf16.mxu0 %v5395_v55 }
0x1739   :  { %4183 = vmatpush3.bf16.msra.mxu0 %v4896_v50 }
0x173a   :  { %4220 = vmatprep.subr.bf16.mxu0 %v5395_v55 }
0x173c   :  { %3786 = vmatmul.mubr.f32.vlgmr.msra.gmra.mrb[22].mxu0 %v1868_v5 }
0x173d   :  { %4222 = vmatpush3.bf16.msra.mxu0 %v4633_v45  ;;  %3853 = vmatprep.mubr.msk.f32.mxu0 %vm4434_vm0, %v4435_v6 }
0x173e   :  { %4223 = vmatprep.subr.bf16.mxu0 %v5395_v55 }
0x1741   :  { %4225 = vmatpush3.bf16.msra.mxu0 %v4651_v52 }
0x1742   :  { %4226 = vmatprep.subr.bf16.mxu0 %v5395_v55 }
0x17ef   :  { %v1935_v32 = vpop.f32.mrb[20].mxu0 }
0x17f0   :  { %v1936_v13 = vadd.f32 %v4756_v1, %v1935_v32  ;;  %v3719_v61 = vpop.f32.mrb[21].mxu0 }
0x17f2   :  { %v2009_v25 = vadd.f32 %v2006_v12, %v1936_v13 }
0x17f4   :  { %v3122_v40 = vmul.f32 -1.442695, %v2009_v25 }
0x17f6   :  { %4341 = vpow2.f32 %v3122_v40 }
0x1800   :  { %v4342_v27 = vpop.eup %4341 }
0x1801   :  { %v2013_v5 = vadd.f32 1.0, %v4342_v27 }
0x1803   :  { %4343 = vrcp.f32 %v2013_v5 }
0x180d   :  { %v4344_v45 = vpop.eup %4343 }
0x180e   :  { %v2020_v3 = vmul.f32 %v4344_v45, %v2018_v63  ;;  %v2027_v1 = vsub.f32 1.0, %v4344_v45  ;;  %v2033_v16 = vmul.f32 %v4344_v45, %v5049_v22 }
0x180f   :  { %v5191_v62 = vpop.f32.mrb[22].mxu0 }
0x1810   :  { %v3787_v2 = vpop.f32.mrb[23].mxu0  ;;  %2022 = vrot.lane.b32.xlu0 %v2020_v3, %s4438_s18 }
0x1882   :  { %v2023_v52 = vpop.permute.xlu0 %2022 }
0x1883   :  { %v2025_v20 = vadd.f32 %v2023_v52, %v1936_v13 }
0x1885   :  { %4345 = vtanh.f32 %v2025_v20 }
0x188f   :  { %v4346_v8 = vpop.eup %4345 }
0x1890   :  { %2029 = vrot.lane.b32.xlu0 %v4346_v8, %s4439_s13 }
0x1902   :  { %v2030_v12 = vpop.permute.xlu0 %2029 }
0x1903   :  { %v2032_v26 = vmul.f32 %v2030_v12, %v2027_v1 }
0x1905   :  { %v5196_v35 = vadd.f32 %v2033_v16, %v2032_v26 }
0x1907   :  { %2036 = vrot.lane.b32.xlu1 %v5196_v35, %s4439_s13 }
0x1979   :  { %v2037_v29 = vpop.permute.xlu1 %2036 }
0x197a   :  { %3740 = vmatmul.mubr.msk.f32.vlgmr.msra.gmra.mrb[14].mxu1 %vm184_vm1, %v2037_v29  ;;  %3854 = vmatmul.mubr.msk.f32.vlgmr.msra.gmra.mrb[24].mxu0 %vm184_vm1, %v2037_v29 }
0x197b   :  { %4156 = vmatpush3.bf16.msra.mxu1 %v4769_v28  ;;  %3750 = vmatprep.mubr.msk.f32.mxu1 %vm4434_vm0, %v4435_v6 }
0x197c   :  { %4157 = vmatprep.subr.bf16.mxu1 %v5395_v55  ;;  %4228 = vmatpush3.bf16.msra.mxu0 %v4780_v36 }
0x197d   :  { %4229 = vmatprep.subr.bf16.mxu0 %v5395_v55  ;;  %3864 = vmatprep.mubr.msk.f32.mxu0 %vm4434_vm0, %v4435_v6 }
0x197f   :  { %4159 = vmatpush3.bf16.msra.mxu1 %v4789_v42 }
0x1980   :  { %4184 = vmatprep.subr.bf16.mxu1 %v5395_v55  ;;  %4231 = vmatpush3.bf16.msra.mxu0 %v4793_v44 }
0x1981   :  { %4232 = vmatprep.subr.bf16.mxu0 %v5395_v55 }
0x1982   :  { %3751 = vmatmul.mubr.msk.f32.vlgmr.msra.gmra.mrb[16].mxu1 %vm184_vm1, %v5087_v57 }
0x1983   :  { %4186 = vmatpush3.bf16.msra.mxu1 %v4933_v47  ;;  %3796 = vmatprep.mubr.msk.f32.mxu1 %vm4434_vm0, %v4435_v6 }
0x1984   :  { %4187 = vmatprep.subr.bf16.mxu1 %v5395_v55 }
0x1987   :  { %4189 = vmatpush3.bf16.msra.mxu1 %v4939_v51 }
0x1988   :  { %4190 = vmatprep.subr.bf16.mxu1 %v5395_v55 }
0x1a4d   :  { %v2106_v36 = vpop.f32.mrb[14].mxu1  ;;  %v5222_v22 = vpop.f32.mrb[24].mxu0 }
0x1a4e   :  { %v3741_v44 = vpop.f32.mrb[15].mxu1  ;;  %v3855_v32 = vpop.f32.mrb[25].mxu0  ;;  %v2107_v25 = vadd.f32 %v4918_v0, %v2106_v36 }
0x1a55   :  { %v2176_v13 = vpop.f32.mrb[16].mxu1 }
0x1a56   :  { %v2177_v61 = vadd.f32 %v4814_v58, %v2176_v13  ;;  %v3752_v57 = vpop.f32.mrb[17].mxu1 }
0x1a58   :  { %2188 = vrot.lane.b32.xlu0 %v2177_v61, %s4438_s18  ;;  %v2180_v40 = vadd.f32 %v2177_v61, %v2107_v25 }
0x1a5a   :  { %v3125_v27 = vmul.f32 -1.442695, %v2180_v40 }
0x1a5c   :  { %4347 = vpow2.f32 %v3125_v27 }
0x1a66   :  { %v4348_v5 = vpop.eup %4347 }
0x1a67   :  { %v2184_v45 = vadd.f32 1.0, %v4348_v5 }
0x1a69   :  { %4349 = vrcp.f32 %v2184_v45 }
0x1a73   :  { %v4350_v63 = vpop.eup %4349 }
0x1a74   :  { %v2198_v8 = vsub.f32 1.0, %v4350_v63  ;;  %v2204_v0 = vmul.f32 %v4350_v63, %v5083_v48 }
0x1aca   :  { %v2189_v3 = vpop.permute.xlu0 %2188 }
0x1acb   :  { %v2191_v2 = vmul.f32 %v4350_v63, %v2189_v3 }
0x1acd   :  { %2193 = vrot.lane.b32.xlu1 %v2191_v2, %s4438_s18 }
0x1b3f   :  { %v2194_v52 = vpop.permute.xlu1 %2193 }
0x1b40   :  { %v2196_v20 = vadd.f32 %v2194_v52, %v2107_v25 }
0x1b42   :  { %4351 = vtanh.f32 %v2196_v20 }
0x1b4c   :  { %v4352_v58 = vpop.eup %4351 }
0x1b4d   :  { %2200 = vrot.lane.b32.xlu0 %v4352_v58, %s4439_s13 }
0x1bbf   :  { %v2201_v1 = vpop.permute.xlu0 %2200 }
0x1bc0   :  { %v2203_v12 = vmul.f32 %v2201_v1, %v2198_v8 }
0x1bc2   :  { %v5230_v16 = vadd.f32 %v2204_v0, %v2203_v12 }
0x1bc4   :  { %2277 = vrot.lane.b32.xlu1 %v5230_v16, %s4439_s13 }
0x1c36   :  { %v5234_v26 = vpop.permute.xlu1 %2277 }
0x1c37   :  { %3797 = vmatmul.mubr.msk.f32.vlgmr.msra.gmra.mrb[18].mxu1 %vm184_vm1, %v5234_v26 }
0x1c38   :  { %4192 = vmatpush3.bf16.msra.mxu1 %v4547_v30  ;;  %3807 = vmatprep.mubr.msk.f32.mxu1 %vm4434_vm0, %v4435_v6 }
0x1c39   :  { %4193 = vmatprep.subr.bf16.mxu1 %v5395_v55 }
0x1c3c   :  { %4195 = vmatpush3.bf16.msra.mxu1 %v4558_v33 }
0x1c3d   :  { %4196 = vmatprep.subr.bf16.mxu1 %v5395_v55 }
0x1c3f   :  { %3808 = vmatmul.mubr.msk.f32.vlgmr.msra.gmra.mrb[20].mxu1 %vm184_vm1, %v5234_v26 }
0x1c40   :  { %4198 = vmatpush3.bf16.msra.mxu1 %v4653_v53  ;;  %3842 = vmatprep.mubr.msk.f32.mxu1 %vm4434_vm0, %v4435_v6 }
0x1c41   :  { %4199 = vmatprep.subr.bf16.mxu1 %v5395_v55 }
0x1c44   :  { %4201 = vmatpush3.bf16.msra.mxu1 %v4657_v54 }
0x1c45   :  { %4202 = vmatprep.subr.bf16.mxu1 %v5395_v55 }
0x1c48   :  { %4204 = vmatpush3.bf16.msra.mxu1 %v4674_v60 }
0x1c49   :  { %4205 = vmatprep.subr.bf16.mxu1 %v5395_v55 }
0x1c4c   :  { %4207 = vmatpush3.bf16.msra.mxu1 %v4691_v9 }
0x1c4d   :  { %4208 = vmatprep.subr.bf16.mxu1 %v5395_v55 }
0x1c50   :  { %4210 = vmatpush3.bf16.msra.mxu1 %v4701_v15 }
0x1c51   :  { %4211 = vmatprep.subr.bf16.mxu1 %v5395_v55 }
0x1c54   :  { %4213 = vmatpush3.bf16.msra.mxu1 %v4711_v18 }
0x1c55   :  { %4214 = vmatprep.subr.bf16.mxu1 %v5395_v55 }
0x1c58   :  { %4216 = vmatpush3.bf16.msra.mxu1 %v4721_v21 }
0x1c59   :  { %4217 = vmatprep.subr.bf16.mxu1 %v5395_v55 }
0x1c5c   :  { %4219 = vmatpush3.bf16.msra.mxu1 %v4731_v24 }
0x1c5d   :  { %4238 = vmatprep.subr.bf16.mxu1 %v5395_v55 }
0x1d0a   :  { %v2347_v30 = vpop.f32.mrb[18].mxu1 }
0x1d0b   :  { %v2348_v33 = vadd.f32 %v2347_v30, %v5191_v62  ;;  %v3798_v53 = vpop.f32.mrb[19].mxu1 }
0x1d0d   :  { %v2351_v54 = vadd.f32 %v4984_v34, %v2348_v33 }
0x1d0f   :  { %2353 = vst [vmem:[#allocation2 + $0x4] sm:$0x3] %v2351_v54 }
0x1d12   :  { %v2422_v60 = vpop.f32.mrb[20].mxu1 }
0x1d13   :  { %v2433_v9 = vrot.slane %v2422_v60, %v4585_v49  ;;  %v3809_v15 = vpop.f32.mrb[21].mxu1 }
0x1d15   :  { %v2434_v18 = vcombine.high %v2433_v9, %v2433_v9  ;;  %v2441_v21 = vrot.slane %v2433_v9, %v4585_v49 }
0x1d17   :  { %v2448_v48 = vrot.slane %v2434_v18, %v4585_v49  ;;  %v2452_v24 = vrot.slane %v2441_v21, %v4576_v39 }
0x1d19   :  { %v2456_v29 = vrot.slane %v2448_v48, %v4576_v39  ;;  %v2459_v36 = vadd.f32 %v2452_v24, %v4592_v56 }
0x1d1b   :  { %v2460_v62 = vadd.f32 %v2456_v29, %v4596_v59  ;;  %4353 = vtanh.f32 %v2459_v36 }
0x1d1d   :  { %4355 = vtanh.f32 %v2460_v62 }
0x1d25   :  { %v4354_v34 = vpop.eup %4353 }
0x1d26   :  { %v2463_v44 = vmul.f32 %v5129_v11, %v4354_v34 }
0x1d27   :  { %v4356_v32 = vpop.eup %4355 }
0x1d28   :  { %2465 = vadd.xlane.f32.xlu0 %v2463_v44  ;;  %v2464_v13 = vmul.f32 %v5129_v11, %v4356_v32 }
0x1d2a   :  { %2467 = vadd.xlane.f32.xlu1 %v2464_v13 }
0x1db5   :  { %v2466_v61 = vpop.xlane.xlu0 %2465 }
0x1db6   :  { %v2469_v49 = vadd.f32 %v2466_v61, %v4608_v7 }
0x1db7   :  { %v2468_v57 = vpop.xlane.xlu1 %2467 }
0x1db8   :  { %v2470_v25 = vadd.f32 %v2468_v57, %v4611_v10  ;;  %2474 = vperm.xlu0 %4279, %v2469_v49  }
0x1dba   :  { %2477 = vperm.xlu1 %4280, %v2470_v25  }
0x1e37   :  { %v2475_v56 = vpop.permute.xlu0 %2474 }
0x1e38   :  { %v2482_v40 = vrot.slane %v2475_v56, %v4574_v38 }
0x1e39   :  { %v2478_v59 = vpop.permute.xlu1 %2477 }
0x1e3a   :  { %v2486_v27 = vrot.slane %v2478_v59, %v4574_v38  ;;  %v3127_v59 = vld [vmem:[%s5386_s0 + $0x6] sm:$0x3] }
0x1e3c   :  { %v2487_v5 = vsel %vm342_vm2, %v2486_v27, %v2482_v40 }
0x1e3d   :  { %v2489_v45 = vsel %vm345_vm3, %v2487_v5, -inf }
0x1e3e   :  { %2490 = vmax.xlane.f32.xlu0 %v2489_v45 }
0x1ecb   :  { %v2491_v11 = vpop.xlane.xlu0 %2490 }
0x1ecc   :  { %v2496_v63 = vrot.slane %v2491_v11, %v4576_v39  ;;  %v2500_v7 = vrot.slane %v2491_v11, %v4581_v41 }
0x1ece   :  { %v2503_v3 = vsub.f32 %v2469_v49, %v2496_v63  ;;  %v2504_v10 = vsub.f32 %v2470_v25, %v2500_v7 }
0x1ed0   :  { %v2505_v2 = vmul.f32 1.442695, %v2503_v3  ;;  %v2507_v52 = vmul.f32 1.442695, %v2504_v10 }
0x1ed2   :  { %4357 = vpow2.f32 %v2505_v2 }
0x1ed3   :  { %4359 = vpow2.f32 %v2507_v52 }
0x1edc   :  { %v4358_v20 = vpop.eup %4357 }
0x1edd   :  { %2512 = vperm.xlu1 %4280, %v4358_v20   ;;  %v4360_v58 = vpop.eup %4359 }
0x1ee1   :  { %2515 = vperm.xlu1 %4280, %v4360_v58  }
0x1f5c   :  { %v2513_v8 = vpop.permute.xlu1 %2512 }
0x1f5d   :  { %v2520_v0 = vrot.slane %v2513_v8, %v4574_v38 }
0x1f60   :  { %v2516_v1 = vpop.permute.xlu1 %2515 }
0x1f61   :  { %v2524_v12 = vrot.slane %v2516_v1, %v4574_v38  ;;  %v4380_v38 = vld [vmem:[%s5390_s4 + $0x158] ss:$0 sm:$0xff] }
0x1f62   :  { %v2711_v48 = vadd.f32 %v4380_v38, %v5222_v22 }
0x1f63   :  { %v2525_v30 = vsel %vm342_vm2, %v2524_v12, %v2520_v0 }
0x1f64   :  { %v2527_v33 = vsel %vm345_vm3, %v2525_v30, 0.0 }
0x1f65   :  { %2528 = vadd.xlane.f32.xlu1 %v2527_v33 }
0x1ff2   :  { %v2529_v53 = vpop.xlane.xlu1 %2528 }
0x1ff3   :  { %v2534_v54 = vrot.slane %v2529_v53, %v4576_v39  ;;  %v2538_v60 = vrot.slane %v2529_v53, %v4581_v41 }
0x1ff5   :  { %4361 = vrcp.f32 %v2534_v54 }
0x1ff6   :  { %4363 = vrcp.f32 %v2538_v60 }
0x1fff   :  { %v4362_v9 = vpop.eup %4361 }
0x2000   :  { %v4364_v15 = vpop.eup %4363  ;;  %v2542_v18 = vmul.f32 %v4362_v9, %v4358_v20 }
0x2001   :  { %v2544_v21 = vmul.f32 %v4364_v15, %v4360_v58 }
0x2002   :  { %2547 = vperm.xlu0 %4279, %v2542_v18  }
0x2003   :  { %2552 = vperm.xlu1 %4280, %v2544_v21  }
0x2006   :  { %2722 = vrot.lane.b32.xlu0 %v2711_v48, %s4438_s18 }
0x2081   :  { %v2548_v24 = vpop.permute.xlu0 %2547 }
0x2082   :  { %v2553_v39 = vpop.permute.xlu1 %2552  ;;  %v2555_v41 = vmul.f32 %v5153_v17, %v2548_v24 }
0x2083   :  { %v2556_v29 = vmul.f32 %v5159_v43, %v2553_v39 }
0x2084   :  { %v2557_v36 = vrot.slane %v2555_v41, 4 }
0x2085   :  { %v2563_v62 = vrot.slane %v2556_v29, 4 }
0x2086   :  { %v2558_v34 = vadd.f32 %v2557_v36, %v2555_v41 }
0x2087   :  { %v2564_v44 = vadd.f32 %v2563_v62, %v2556_v29 }
0x2088   :  { %v2559_v32 = vrot.slane %v2558_v34, 2 }
0x2089   :  { %v2565_v13 = vrot.slane %v2564_v44, 2 }
0x208a   :  { %v2560_v61 = vadd.f32 %v2559_v32, %v2558_v34 }
0x208b   :  { %v2566_v49 = vadd.f32 %v2565_v13, %v2564_v44 }
0x208c   :  { %v2561_v57 = vrot.slane %v2560_v61, 1 }
0x208d   :  { %v2567_v25 = vrot.slane %v2566_v49, 1 }
0x208e   :  { %v2562_v56 = vadd.f32 %v2561_v57, %v2560_v61 }
0x208f   :  { %v2568_v22 = vadd.f32 %v2567_v25, %v2566_v49 }
0x2091   :  { %v2571_v17 = vsel %vm342_vm2, %v2568_v22, %v2562_v56 }
0x2092   :  { %v2573_v40 = vadd.f32 %v3127_v59, %v2571_v17 }
0x2094   :  { %3843 = vmatmul.mubr.f32.vlgmr.msra.gmra.mrb[22].mxu1 %v2573_v40 }
0x2095   :  { %4240 = vmatpush3.bf16.msra.mxu1 %v4824_v4  ;;  %3910 = vmatprep.mubr.msk.f32.mxu1 %vm4434_vm0, %v4435_v6 }
0x2096   :  { %4241 = vmatprep.subr.bf16.mxu1 %v5395_v55 }
0x2099   :  { %4243 = vmatpush3.bf16.msra.mxu1 %v4834_v14  ;;  %v4381_v14 = vld [vmem:[%s5390_s4 + $0x150] ss:$0 sm:$0xff] }
0x209a   :  { %4244 = vmatprep.subr.bf16.mxu1 %v5395_v55 }
0x209d   :  { %4246 = vmatpush3.bf16.msra.mxu1 %v4846_v19 }
0x209e   :  { %4247 = vmatprep.subr.bf16.mxu1 %v5395_v55 }
0x20a1   :  { %4249 = vmatpush3.bf16.msra.mxu1 %v4856_v23 }
0x20a2   :  { %4250 = vmatprep.subr.bf16.mxu1 %v5395_v55 }
0x20a5   :  { %4252 = vmatpush3.bf16.msra.mxu1 %v4866_v31 }
0x20a6   :  { %4253 = vmatprep.subr.bf16.mxu1 %v5395_v55 }
0x20a9   :  { %4255 = vmatpush3.bf16.msra.mxu1 %v4876_v37 }
0x20aa   :  { %4256 = vmatprep.subr.bf16.mxu1 %v5395_v55 }
0x20ad   :  { %4258 = vmatpush3.bf16.msra.mxu1 %v4886_v46  ;;  %v2723_v46 = vpop.permute.xlu0 %2722 }
0x20ae   :  { %4259 = vmatprep.subr.bf16.mxu1 %v5395_v55 }
0x20b1   :  { %4261 = vmatpush3.bf16.msra.mxu1 %v4896_v50 }
0x20b4   :  { %3911 = vmatmul.mubr.f32.vlgmr.msra.gmra.mrb[24].mxu1 %v2573_v40 }
0x2167   :  { %v2640_v4 = vpop.f32.mrb[22].mxu1 }
0x2168   :  { %v2641_v19 = vadd.f32 %v4381_v14, %v2640_v4  ;;  %v3844_v23 = vpop.f32.mrb[23].mxu1 }
0x216a   :  { %v2714_v31 = vadd.f32 %v2711_v48, %v2641_v19 }
0x216c   :  { %v3130_v43 = vmul.f32 -1.442695, %v2714_v31 }
0x216e   :  { %4365 = vpow2.f32 %v3130_v43 }
0x2178   :  { %v4366_v37 = vpop.eup %4365 }
0x2179   :  { %v2718_v27 = vadd.f32 1.0, %v4366_v37 }
0x217b   :  { %4367 = vrcp.f32 %v2718_v27 }
0x2185   :  { %v4368_v5 = vpop.eup %4367 }
0x2186   :  { %v2725_v45 = vmul.f32 %v4368_v5, %v2723_v46  ;;  %v2732_v10 = vsub.f32 1.0, %v4368_v5  ;;  %v2738_v52 = vmul.f32 %v4368_v5, %v5196_v35 }
0x2187   :  { %v5320_v11 = vpop.f32.mrb[24].mxu1 }
0x2188   :  { %v3912_v50 = vpop.f32.mrb[25].mxu1  ;;  %2727 = vrot.lane.b32.xlu0 %v2725_v45, %s4438_s18 }
0x21fa   :  { %v2728_v63 = vpop.permute.xlu0 %2727 }
0x21fb   :  { %v2730_v7 = vadd.f32 %v2728_v63, %v2641_v19 }
0x21fd   :  { %4369 = vtanh.f32 %v2730_v7 }
0x2207   :  { %v4370_v3 = vpop.eup %4369 }
0x2208   :  { %2734 = vrot.lane.b32.xlu0 %v4370_v3, %s4439_s13 }
0x227a   :  { %v2735_v2 = vpop.permute.xlu0 %2734 }
0x227b   :  { %v2737_v20 = vmul.f32 %v2735_v2, %v2732_v10 }
0x227d   :  { %v2739_v58 = vadd.f32 %v2738_v52, %v2737_v20 }
0x227f   :  { %2741 = vrot.lane.b32.xlu1 %v2739_v58, %s4439_s13 }
0x22f1   :  { %v2742_v8 = vpop.permute.xlu1 %2741 }
0x22f2   :  { %3865 = vmatmul.mubr.msk.f32.vlgmr.msra.gmra.mrb[26].mxu0 %vm184_vm1, %v2742_v8  ;;  %3061 = vst.msk [vmem:[#allocation4] sm:$0x3] %vm3060_vm4, %v2742_v8 }
0x22f3   :  { %4234 = vmatpush3.bf16.msra.mxu0 %v4769_v28  ;;  %3875 = vmatprep.mubr.msk.f32.mxu0 %vm4434_vm0, %v4435_v6 }
0x22f4   :  { %4235 = vmatprep.subr.bf16.mxu0 %v5395_v55 }
0x22f7   :  { %4237 = vmatpush3.bf16.msra.mxu0 %v4789_v42  ;;  %v4382_v42 = vld [vmem:[%s5390_s4 + $0x1a8] ss:$0 sm:$0xff] }
0x22f8   :  { %4262 = vmatprep.subr.bf16.mxu0 %v5395_v55 }
0x22fa   :  { %3876 = vmatmul.mubr.msk.f32.vlgmr.msra.gmra.mrb[28].mxu0 %vm184_vm1, %v5234_v26 }
0x22fb   :  { %4264 = vmatpush3.bf16.msra.mxu0 %v4933_v47  ;;  %3921 = vmatprep.mubr.msk.f32.mxu0 %vm4434_vm0, %v4435_v6  ;;  %v4383_v47 = vld [vmem:[%s5390_s4 + $0x1a0] ss:$0 sm:$0xff] }
0x22fc   :  { %4265 = vmatprep.subr.bf16.mxu0 %v5395_v55 }
0x22ff   :  { %4267 = vmatpush3.bf16.msra.mxu0 %v4939_v51 }
0x23c5   :  { %v2811_v28 = vpop.f32.mrb[26].mxu0 }
0x23c6   :  { %v3866_v35 = vpop.f32.mrb[27].mxu0  ;;  %v2812_v6 = vadd.f32 %v4383_v47, %v2811_v28 }
0x23cd   :  { %v2881_v1 = vpop.f32.mrb[28].mxu0 }
0x23ce   :  { %v2882_v0 = vadd.f32 %v4382_v42, %v2881_v1  ;;  %v3877_v12 = vpop.f32.mrb[29].mxu0 }
0x23d0   :  { %2893 = vrot.lane.b32.xlu0 %v2882_v0, %s4438_s18  ;;  %v2885_v26 = vadd.f32 %v2882_v0, %v2812_v6 }
0x23d2   :  { %v3133_v55 = vmul.f32 -1.442695, %v2885_v26 }
0x23d4   :  { %4371 = vpow2.f32 %v3133_v55 }
0x23de   :  { %v4372_v51 = vpop.eup %4371 }
0x23df   :  { %v2889_v30 = vadd.f32 1.0, %v4372_v51 }
0x23e1   :  { %4373 = vrcp.f32 %v2889_v30 }
0x23eb   :  { %v4374_v33 = vpop.eup %4373 }
0x23ec   :  { %v2903_v18 = vsub.f32 1.0, %v4374_v33  ;;  %v2909_v38 = vmul.f32 %v4374_v33, %v5230_v16 }
0x2442   :  { %v2894_v53 = vpop.permute.xlu0 %2893 }
0x2443   :  { %v2896_v54 = vmul.f32 %v4374_v33, %v2894_v53 }
0x2445   :  { %2898 = vrot.lane.b32.xlu1 %v2896_v54, %s4438_s18  ;;  %s4441_s18 = smov [#allocation4]  }
0x2446   :  { %s3082_s8 = sshll.u32 %s4441_s18, 4  ;;  %s3083_s8 = int_to_ptr.vmem [resolvable:$true] %s3082_s8 }
0x2447   :  { %s4385_s9 = scalar_lea.vmem %s3083_s8, 64  ;;  %p4390_p1 = scmp.lt.s32.totalorder %s3083_s8, %s3083_s8 }
0x2448   :  { %p4386_p0 = scmp.ne.s32.totalorder %s3083_s8, %s4385_s9  ;;  %p4391_p2 = scmp.lt.s32.totalorder %s4385_s9, %s4385_s9 }
0x244a   :  { %p4392_p3 = por %p4391_p2, %p4390_p1 }
0x244c   :  { %p4393_p4 = pnand %p4392_p3, %p4386_p0 }
0x24b7   :  { %v2899_v60 = vpop.permute.xlu1 %2898 }
0x24b8   :  { %v2901_v9 = vadd.f32 %v2899_v60, %v2812_v6 }
0x24ba   :  { %4375 = vtanh.f32 %v2901_v9 }
0x24c4   :  { %v4376_v15 = vpop.eup %4375 }
0x24c5   :  { %2905 = vrot.lane.b32.xlu0 %v4376_v15, %s4439_s13 }
0x2537   :  { %v2906_v21 = vpop.permute.xlu0 %2905 }
0x2538   :  { %v2908_v48 = vmul.f32 %v2906_v21, %v2903_v18 }
0x253a   :  { %v2910_v24 = vadd.f32 %v2909_v38, %v2908_v48 }
0x253c   :  { %2982 = vrot.lane.b32.xlu1 %v2910_v24, %s4439_s13 }
0x25ae   :  { %v2983_v39 = vpop.permute.xlu1 %2982 }
0x25af   :  { %3064 = vst.msk [vmem:[#allocation4 + $0x2] sm:$0x3] %vm3060_vm4, %v2983_v39  ;;  %3922 = vmatmul.mubr.msk.f32.vlgmr.msra.gmra.mrb[30].mxu0 %vm184_vm1, %v2983_v39 }
0x25b0   :  { %4396 = shalt.err (!%p4393_p4)
}
0x25b1   :  { %s4397_s12 = scalar_lea.hbm %s5392_s6, 64 }
0x25b2   :  { %p4398_p5 = scmp.ne.s32.totalorder %s5392_s6, %s4397_s12  ;;  %p4401_p6 = scmp.lt.u32.totalorder %s4397_s12, %s5392_s6 }
0x25b4   :  { %p4403_p7 = pnand %p4401_p6, %p4398_p5 }
0x25b6   :  { %4406 = shalt.err (!%p4403_p7)
}
0x25b7   :  { %s4442_s19 = smov 2   ;;  %s4443_s1 = smov [#allocation2]   ;;  %v4384_v36 = vld [vmem:[%s5390_s4 + $0x250] ss:$0 sm:$0xff] }
0x25b8   :  { %3088 = dma.vmem_to_hbm [thread:$0]  %s3083_s8, 64, %s5392_s6, [#allocation5], %s4440_s14, %s4440_s14, %s4442_s19  }
0x25b9   :  { %s3070_s21 = sshll.u32 %s4443_s1, 4  ;;  %s3071_s21 = int_to_ptr.vmem [resolvable:$true] %s3070_s21 }
0x25ba   :  { %s4407_s2 = scalar_lea.vmem %s3071_s21, 128  ;;  %p4412_p9 = scmp.lt.s32.totalorder %s3071_s21, %s3071_s21 }
0x25bb   :  { %p4408_p8 = scmp.ne.s32.totalorder %s3071_s21, %s4407_s2  ;;  %p4413_p10 = scmp.lt.s32.totalorder %s4407_s2, %s4407_s2 }
0x25bd   :  { %p4414_p11 = por %p4413_p10, %p4412_p9 }
0x25bf   :  { %p4415_p12 = pnand %p4414_p11, %p4408_p8 }
0x2682   :  { %v3052_v16 = vpop.f32.mrb[30].mxu0 }
0x2683   :  { %v3053_v41 = vadd.f32 %v3052_v16, %v5320_v11  ;;  %v3923_v29 = vpop.f32.mrb[31].mxu0 }
0x2685   :  { %v3056_v62 = vadd.f32 %v4384_v36, %v3053_v41 }
0x2687   :  { %3058 = vst [vmem:[#allocation2 + $0x6] sm:$0x3] %v3056_v62 }
0x2688   :  { %4418 = shalt.err (!%p4415_p12)
}
0x2689   :  { %s4419_s25 = scalar_lea.hbm %s5391_s5, 128 }
0x268a   :  { %p4420_p13 = scmp.ne.s32.totalorder %s5391_s5, %s4419_s25  ;;  %p4423_p0 = scmp.lt.u32.totalorder %s4419_s25, %s5391_s5 }
0x268c   :  { %p4425_p1 = pnand %p4423_p0, %p4420_p13 }
0x268e   :  { %4428 = shalt.err (!%p4425_p1)
}
0x268f   :  { %3076 = dma.vmem_to_hbm [thread:$0]  %s3071_s21, 128, %s5391_s5, [#allocation3], %s4440_s14, %s4440_s14, %s4442_s19  }
0x2690   :  { %4429 = dma.done.wait [#allocation3], 128  }
0x2691   :  { %4430 = vsyncadd [#allocation3], 4294967168 }
0x2692   :  { %4431 = dma.done.wait [#allocation5], 64  }
0x2693   :  { %4432 = vsyncadd [#allocation5], 4294967232 }
0x2694   :  { %3095 = vsyncpa [#allocation3], 1 }
0x2695   :  { %3096 = vsyncpa [#allocation5], 1 }

</bundles_post_ra>
